<compile_context>
chip_gen: v5e
topology: v5e:2x2
jax: 0.10.0
libtpu: 0.0.40
codegen_flags: <defaults>
</compile_context>

<pallas_src>
import functools

import jax
import jax.numpy as jnp
from jax.experimental import pallas as pl
from jax.experimental.pallas import tpu as pltpu

NUM_BLOCKS = 6
HIDDEN = 128
EPS = 1e-5


def marblenet_kernel(
    x_ref,       # (BB, Tp, Cin) bf16  channels-last input chunk
    w0_ref,      # (Cin, 3H)     bf16  initial conv, BN-scale folded, N-stacked taps
    b0_ref,      # (1, H)        f32   initial conv bias + BN shift
    wres_ref,    # (NB, 3H, H)   bf16  fused depthwise+pointwise, BN-scale folded
    bres_ref,    # (NB, 1, H)    f32   per-block BN shift (bias)
    wout_ref,    # (H, H)        bf16  output conv, BN-scale folded
    bout_ref,    # (1, H)        f32   output conv bias + BN shift
    o_ref,       # (BB, Tp, H)   f32   channels-last output chunk
    *, t_valid,
):
    BB, Tp, Cin = x_ref.shape
    H = HIDDEN
    M = BB * Tp

    # (BB, Tp, Cin) -> (M, Cin).  Tp % 16 == 0, so the merge is layout-trivial.
    x = x_ref[...].reshape(M, Cin)

    # Per-sequence boundary masks: computed and lane-broadcast ONCE (JAX does
    # not CSE broadcast_in_dim), reused by all temporal shifts below.
    tpos = jax.lax.broadcasted_iota(jnp.int32, (M, 1), 0) % Tp
    nf = jnp.broadcast_to(tpos != 0, (M, H))               # row is not t == 0
    nl = jnp.broadcast_to(tpos != (t_valid - 1), (M, H))   # row is not last valid t

    def shift_down(v):  # out[t] = v[t-1], zero at each sequence start
        r = pltpu.roll(v, shift=1, axis=0)
        return jnp.where(nf, r, jnp.zeros_like(r))

    def shift_up(v):    # out[t] = v[t+1], zero at each sequence end
        r = pltpu.roll(v, shift=M - 1, axis=0)
        return jnp.where(nl, r, jnp.zeros_like(r))

    # ---- initial_conv: Conv1d(Cin->H, k=3, pad=1) + folded BN + ReLU --------
    # Single MXU contraction against the N-stacked weight (Cin, 3H); the three
    # k-taps are recombined with lane-aligned 128-wide slices + sublane rolls.
    y = jnp.dot(x, w0_ref[...], preferred_element_type=jnp.float32)   # (M, 3H)
    h = shift_down(y[:, 0:H]) + y[:, H:2 * H] + shift_up(y[:, 2 * H:3 * H])
    h = jnp.maximum(h + b0_ref[...], 0.0)                             # (M, H) f32

    # ---- residual blocks: fused depthwise+pointwise as one K=384 matmul -----
    for i in range(NUM_BLOCKS):
        hl = shift_down(h).astype(jnp.bfloat16)
        hm = h.astype(jnp.bfloat16)
        hr = shift_up(h).astype(jnp.bfloat16)
        op = jnp.concatenate([hl, hm, hr], axis=1)                     # (M, 3H) bf16
        p = jnp.dot(op, wres_ref[i], preferred_element_type=jnp.float32)
        p = jnp.maximum(p + bres_ref[i], 0.0)                          # folded BN + ReLU
        h = h + p                                                      # Dropout == identity (eval)

    # ---- output_conv: Conv1d(H->H, k=1) + folded BN + ReLU ------------------
    o = jnp.dot(h.astype(jnp.bfloat16), wout_ref[...],
                preferred_element_type=jnp.float32)
    o = jnp.maximum(o + bout_ref[...], 0.0)                            # (M, H)

    # Lane-dense channels-last store (H = 128 lanes, unmasked vst).
    o_ref[...] = o.reshape(BB, Tp, H).astype(o_ref.dtype)


def _pick_batch_chunk(B, Tp, *, min_rows=512, max_rows=2048):
    """Pick batch-chunk BB (divisor of B): target 512..2048 matmul rows per grid
    step, keep grid >= 2 when possible (v7x: 2 TensorCores), cap rows for VMEM."""
    divisors = [d for d in range(1, B + 1) if B % d == 0]
    within = [d for d in divisors if d * Tp <= max_rows] or [1]
    pref = [d for d in within if B // d >= 2] or within
    meeting = [d for d in pref if d * Tp >= min_rows]
    return min(meeting) if meeting else max(pref)


def marblenet_forward(x_bct, params):
    """x_bct: (B, Cin, T) float32 (PyTorch layout). Returns (B, HIDDEN, T) float32."""
    B, Cin, T = x_bct.shape
    H = HIDDEN
    NB = NUM_BLOCKS

    # Channels-last, bf16 (every consumer is a bf16 matmul) -> half input HBM bytes.
    x = jnp.transpose(x_bct, (0, 2, 1)).astype(jnp.bfloat16)          # (B, T, Cin)
    Tp = ((T + 15) // 16) * 16                                        # bf16/f32 sublane-tile safe
    if Tp != T:
        x = jnp.pad(x, ((0, 0), (0, Tp - T), (0, 0)))

    BB = _pick_batch_chunk(B, Tp)
    grid = (B // BB,)

    flops = 2 * B * Tp * (Cin * 3 * H + NB * 3 * H * H + H * H)
    param_bytes = (Cin * 3 * H + NB * 3 * H * H + H * H) * 2 + (2 * H + NB * H) * 4
    bytes_accessed = B * Tp * Cin * 2 + B * Tp * H * 4 + param_bytes

    full2 = lambda shape: pl.BlockSpec(shape, lambda g: (0, 0))
    full3 = lambda shape: pl.BlockSpec(shape, lambda g: (0, 0, 0))

    out_tl = pl.pallas_call(
        functools.partial(marblenet_kernel, t_valid=T),
        out_shape=jax.ShapeDtypeStruct((B, Tp, H), jnp.float32),
        grid_spec=pltpu.PrefetchScalarGridSpec(
            num_scalar_prefetch=0,
            grid=grid,
            in_specs=[
                pl.BlockSpec((BB, Tp, Cin), lambda g: (g, 0, 0)),     # x
                full2((Cin, 3 * H)),                                  # w0 (N-stacked, bf16)
                full2((1, H)),                                        # b0
                full3((NB, 3 * H, H)),                                # fused block weights (bf16)
                full3((NB, 1, H)),                                    # per-block bias
                full2((H, H)),                                        # w_out (bf16)
                full2((1, H)),                                        # b_out
            ],
            out_specs=pl.BlockSpec((BB, Tp, H), lambda g: (g, 0, 0)),
        ),
        compiler_params=pltpu.CompilerParams(
            dimension_semantics=("parallel",),       # batch-chunk axis, megacore-shardable
            vmem_limit_bytes=48 * 1024 * 1024,       # fits all generations (v7x: 64 MiB phys)
        ),
        cost_estimate=pl.CostEstimate(
            flops=flops, transcendentals=0, bytes_accessed=bytes_accessed),
    )(
        x,
        params["w0_stack"], params["b0"],
        params["w_res"], params["b_res"],
        params["w_out"], params["b_out"],
    )

    # NCW (PyTorch) layout restored in the wrapper; drop the T padding.
    return jnp.transpose(out_tl[:, :T, :], (0, 2, 1))


def _fold_bn(gamma, beta, mean, var):
    scale = gamma / jnp.sqrt(var + EPS)
    shift = beta - mean * scale
    return scale, shift


def make_params(key, in_channels):
    """Random PyTorch-equivalent parameters (eval-mode BN with fresh stats)."""
    keys = jax.random.split(key, 12)
    H = HIDDEN
    NB = NUM_BLOCKS
    return {
        # initial conv: layout (k, ci, co) == PyTorch weight (co, ci, k) transposed
        "w_init": 0.05 * jax.random.normal(keys[0], (3, in_channels, H), jnp.float32),
        "b_init": 0.05 * jax.random.normal(keys[1], (H,), jnp.float32),
        "bn0_gamma": 1.0 + 0.1 * jax.random.normal(keys[2], (H,), jnp.float32),
        "bn0_beta": 0.1 * jax.random.normal(keys[3], (H,), jnp.float32),
        "bn0_mean": jnp.zeros((H,), jnp.float32),
        "bn0_var": jnp.ones((H,), jnp.float32),
        # residual blocks: depthwise (blk, k, c), pointwise (blk, ci, co)
        "dw": 0.2 * jax.random.normal(keys[4], (NB, 3, H), jnp.float32),
        "pw": 0.05 * jax.random.normal(keys[5], (NB, H, H), jnp.float32),
        "bnr_gamma": 1.0 + 0.1 * jax.random.normal(keys[6], (NB, H), jnp.float32),
        "bnr_beta": 0.1 * jax.random.normal(keys[7], (NB, H), jnp.float32),
        "bnr_mean": jnp.zeros((NB, H), jnp.float32),
        "bnr_var": jnp.ones((NB, H), jnp.float32),
        # output conv (k=1): (ci, co)
        "w_out": 0.05 * jax.random.normal(keys[8], (H, H), jnp.float32),
        "b_out": 0.05 * jax.random.normal(keys[9], (H,), jnp.float32),
        "bno_gamma": 1.0 + 0.1 * jax.random.normal(keys[10], (H,), jnp.float32),
        "bno_beta": 0.1 * jax.random.normal(keys[11], (H,), jnp.float32),
        "bno_mean": jnp.zeros((H,), jnp.float32),
        "bno_var": jnp.ones((H,), jnp.float32),
    }


def prepare_params(raw):
    """Fold BatchNorm into conv weights/biases and fuse depthwise into pointwise."""
    H = HIDDEN
    NB = NUM_BLOCKS
    s0, t0 = _fold_bn(raw["bn0_gamma"], raw["bn0_beta"], raw["bn0_mean"], raw["bn0_var"])
    sr, tr = _fold_bn(raw["bnr_gamma"], raw["bnr_beta"], raw["bnr_mean"], raw["bnr_var"])
    so, to = _fold_bn(raw["bno_gamma"], raw["bno_beta"], raw["bno_mean"], raw["bno_var"])

    # initial conv: BN scale on output channels, then N-stack the 3 taps:
    # (3, Cin, H) -> (Cin, 3H); columns [k*H:(k+1)*H] belong to tap k.
    w0 = raw["w_init"] * s0[None, None, :]
    w0_stack = jnp.concatenate([w0[0], w0[1], w0[2]], axis=1)           # (Cin, 3H)
    b0 = (raw["b_init"] * s0 + t0).reshape(1, H)

    # residual blocks: fold BN scale into pointwise, then fuse depthwise:
    # W_k = diag(dw[:, k]) @ pw, stacked over k on the K axis -> (NB, 3H, H).
    pw = raw["pw"] * sr[:, None, :]
    dw = raw["dw"]
    w_res = jnp.concatenate(
        [dw[:, 0, :, None] * pw, dw[:, 1, :, None] * pw, dw[:, 2, :, None] * pw],
        axis=1)                                                          # (NB, 3H, H)
    b_res = tr.reshape(NB, 1, H)

    w_out = raw["w_out"] * so[None, :]
    b_out = (raw["b_out"] * so + to).reshape(1, H)

    bf16 = jnp.bfloat16
    return {
        "w0_stack": w0_stack.astype(bf16),
        "b0": b0,
        "w_res": w_res.astype(bf16),
        "b_res": b_res,
        "w_out": w_out.astype(bf16),
        "b_out": b_out,
    }


def _bn_ref(x, gamma, beta, mean, var):
    return (x - mean) / jnp.sqrt(var + EPS) * gamma + beta


def marblenet_reference(x_bct, raw):
    """Pure-JAX f32 reference (eval-mode PyTorch semantics), channels-last inside."""
    x = jnp.transpose(x_bct, (0, 2, 1)).astype(jnp.float32)             # (B, T, Cin)

    def shiftl(v):  # v[t-1], zero-padded
        return jnp.pad(v, ((0, 0), (1, 0), (0, 0)))[:, :-1]

    def shiftr(v):  # v[t+1], zero-padded
        return jnp.pad(v, ((0, 0), (0, 1), (0, 0)))[:, 1:]

    w = raw["w_init"]
    h = shiftl(x) @ w[0] + x @ w[1] + shiftr(x) @ w[2] + raw["b_init"]
    h = jnp.maximum(_bn_ref(h, raw["bn0_gamma"], raw["bn0_beta"],
                            raw["bn0_mean"], raw["bn0_var"]), 0.0)
    for i in range(NUM_BLOCKS):
        d = (shiftl(h) * raw["dw"][i, 0] + h * raw["dw"][i, 1]
             + shiftr(h) * raw["dw"][i, 2])
        p = d @ raw["pw"][i]
        p = jnp.maximum(_bn_ref(p, raw["bnr_gamma"][i], raw["bnr_beta"][i],
                                raw["bnr_mean"][i], raw["bnr_var"][i]), 0.0)
        h = h + p
    o = h @ raw["w_out"] + raw["b_out"]
    o = jnp.maximum(_bn_ref(o, raw["bno_gamma"], raw["bno_beta"],
                            raw["bno_mean"], raw["bno_var"]), 0.0)
    return jnp.transpose(o, (0, 2, 1))


if __name__ == "__main__":
    B, C_IN, T = 2, 64, 16
    key = jax.random.PRNGKey(0)
    k_x, k_p = jax.random.split(key)

    x = jax.random.normal(k_x, (B, C_IN, T), jnp.float32)   # PyTorch (B, C, T)
    raw = make_params(k_p, C_IN)
    params = prepare_params(raw)

    out = marblenet_forward(x, params)
    out = jax.block_until_ready(out)

    assert out.shape == (B, HIDDEN, T), out.shape
    assert bool(jnp.all(jnp.isfinite(out)))

    # Loose check vs f32 reference (kernel matmuls run in bf16).
    ref = marblenet_reference(x, raw)
    ok = bool(jnp.all(jnp.abs(out - ref) <= 0.05 + 0.05 * jnp.abs(ref)))
    assert ok, float(jnp.max(jnp.abs(out - ref)))

    print("KERNEL_OK")
</pallas_src>

<mosaic_0001>
module attributes {stable_mosaic.version = 11 : i64} {
  func.func @marblenet_kernel(%arg0: i32, %arg1: memref<1x16x64xbf16, #tpu.memory_space<vmem>>, %arg2: memref<64x384xbf16, #tpu.memory_space<vmem>>, %arg3: memref<1x128xf32, #tpu.memory_space<vmem>>, %arg4: memref<6x384x128xbf16, #tpu.memory_space<vmem>>, %arg5: memref<6x1x128xf32, #tpu.memory_space<vmem>>, %arg6: memref<128x128xbf16, #tpu.memory_space<vmem>>, %arg7: memref<1x128xf32, #tpu.memory_space<vmem>>, %arg8: memref<1x16x128xf32, #tpu.memory_space<vmem>>) attributes {dimension_semantics = [#tpu.dimension_semantics<parallel>], iteration_bounds = array<i64: 2>, scalar_prefetch = 0 : i64, scratch_operands = 0 : i64, tpu.core_type = #tpu.core_type<tc>, window_params = [{transform_indices = @transform_0, window_bounds = array<i64: 1, 16, 64>}, {pipeline_mode = #tpu.pipeline_mode<synchronous>, transform_indices = @transform_1, window_bounds = array<i64: 64, 384>}, {pipeline_mode = #tpu.pipeline_mode<synchronous>, transform_indices = @transform_2, window_bounds = array<i64: 1, 128>}, {pipeline_mode = #tpu.pipeline_mode<synchronous>, transform_indices = @transform_3, window_bounds = array<i64: 6, 384, 128>}, {pipeline_mode = #tpu.pipeline_mode<synchronous>, transform_indices = @transform_4, window_bounds = array<i64: 6, 1, 128>}, {pipeline_mode = #tpu.pipeline_mode<synchronous>, transform_indices = @transform_5, window_bounds = array<i64: 128, 128>}, {pipeline_mode = #tpu.pipeline_mode<synchronous>, transform_indices = @transform_6, window_bounds = array<i64: 1, 128>}, {transform_indices = @transform_7, window_bounds = array<i64: 1, 16, 128>}]} {
    %c0 = arith.constant 0 : index
    %c0_0 = arith.constant 0 : index
    %c0_1 = arith.constant 0 : index
    %0 = vector.load %arg1[%c0, %c0_0, %c0_1] : memref<1x16x64xbf16, #tpu.memory_space<vmem>>, vector<1x16x64xbf16>
    %1 = vector.shape_cast %0 : vector<1x16x64xbf16> to vector<16x64xbf16>
    %2 = tpu.iota {dimensions = array<i32: 0>} : vector<16x1xi32>
    %c16_i32 = arith.constant 16 : i32
    %c0_i32 = arith.constant 0 : i32
    %3 = arith.cmpi eq, %c16_i32, %c0_i32 : i32
    %c1_i32 = arith.constant 1 : i32
    %4 = arith.select %3, %c1_i32, %c16_i32 : i32
    %5 = vector.broadcast %4 : i32 to vector<16x1xi32>
    %6 = arith.remsi %2, %5 : vector<16x1xi32>
    %c0_i32_2 = arith.constant 0 : i32
    %7 = vector.broadcast %c0_i32_2 : i32 to vector<16x1xi32>
    %8 = arith.cmpi ne, %6, %7 : vector<16x1xi32>
    %c0_i32_3 = arith.constant 0 : i32
    %9 = vector.broadcast %c0_i32_3 : i32 to vector<16x1xi32>
    %10 = arith.cmpi slt, %6, %9 : vector<16x1xi32>
    %c0_i32_4 = arith.constant 0 : i32
    %11 = arith.cmpi slt, %4, %c0_i32_4 : i32
    %12 = vector.broadcast %11 : i1 to vector<16x1xi1>
    %13 = vector.broadcast %12 : vector<16x1xi1> to vector<16x1xi1>
    %14 = arith.xori %10, %13 : vector<16x1xi1>
    %15 = arith.andi %14, %8 : vector<16x1xi1>
    %16 = vector.broadcast %4 : i32 to vector<16x1xi32>
    %17 = arith.addi %6, %16 : vector<16x1xi32>
    %18 = arith.select %15, %17, %6 : vector<16x1xi1>, vector<16x1xi32>
    %c0_i32_5 = arith.constant 0 : i32
    %19 = vector.broadcast %c0_i32_5 : i32 to vector<16x1xi32>
    %20 = arith.cmpi ne, %18, %19 : vector<16x1xi32>
    %21 = vector.shape_cast %20 : vector<16x1xi1> to vector<16x1xi1>
    %22 = vector.broadcast %21 : vector<16x1xi1> to vector<16x128xi1>
    %c15_i32 = arith.constant 15 : i32
    %23 = vector.broadcast %c15_i32 : i32 to vector<16x1xi32>
    %24 = arith.cmpi ne, %18, %23 : vector<16x1xi32>
    %25 = vector.shape_cast %24 : vector<16x1xi1> to vector<16x1xi1>
    %26 = vector.broadcast %25 : vector<16x1xi1> to vector<16x128xi1>
    %c0_6 = arith.constant 0 : index
    %c0_7 = arith.constant 0 : index
    %27 = vector.load %arg2[%c0_6, %c0_7] : memref<64x384xbf16, #tpu.memory_space<vmem>>, vector<64x384xbf16>
    %cst = arith.constant dense<0.000000e+00> : vector<16x384xf32>
    %28 = tpu.matmul %1, %27, %cst {dimension_numbers = #tpu.dot_dimension_numbers<[1], [0], [0], [1], [0, 0, 1, 1], [], []>} : vector<16x64xbf16>, vector<64x384xbf16>, vector<16x384xf32> -> vector<16x384xf32>
    %29 = vector.extract_strided_slice %28 {offsets = [0, 0], sizes = [16, 128], strides = [1, 1]} : vector<16x384xf32> to vector<16x128xf32>
    %c1_i32_8 = arith.constant 1 : i32
    %30 = tpu.dynamic_rotate %29 by %c1_i32_8 dim 0 : vector<16x128xf32>, i32 -> vector<16x128xf32>
    %cst_9 = arith.constant 0.000000e+00 : f32
    %31 = vector.broadcast %cst_9 : f32 to vector<16x128xf32>
    %32 = arith.select %22, %30, %31 : vector<16x128xi1>, vector<16x128xf32>
    %33 = vector.extract_strided_slice %28 {offsets = [0, 128], sizes = [16, 128], strides = [1, 1]} : vector<16x384xf32> to vector<16x128xf32>
    %34 = arith.addf %32, %33 : vector<16x128xf32>
    %35 = vector.extract_strided_slice %28 {offsets = [0, 256], sizes = [16, 128], strides = [1, 1]} : vector<16x384xf32> to vector<16x128xf32>
    %c15_i32_10 = arith.constant 15 : i32
    %36 = tpu.dynamic_rotate %35 by %c15_i32_10 dim 0 : vector<16x128xf32>, i32 -> vector<16x128xf32>
    %cst_11 = arith.constant 0.000000e+00 : f32
    %37 = vector.broadcast %cst_11 : f32 to vector<16x128xf32>
    %38 = arith.select %26, %36, %37 : vector<16x128xi1>, vector<16x128xf32>
    %39 = arith.addf %34, %38 : vector<16x128xf32>
    %c0_12 = arith.constant 0 : index
    %c0_13 = arith.constant 0 : index
    %40 = vector.load %arg3[%c0_12, %c0_13] : memref<1x128xf32, #tpu.memory_space<vmem>>, vector<1x128xf32>
    %41 = vector.broadcast %40 : vector<1x128xf32> to vector<16x128xf32>
    %42 = arith.addf %39, %41 : vector<16x128xf32>
    %cst_14 = arith.constant 0.000000e+00 : f32
    %43 = vector.broadcast %cst_14 : f32 to vector<16x128xf32>
    %44 = arith.maximumf %42, %43 : vector<16x128xf32>
    %c1_i32_15 = arith.constant 1 : i32
    %45 = tpu.dynamic_rotate %44 by %c1_i32_15 dim 0 : vector<16x128xf32>, i32 -> vector<16x128xf32>
    %cst_16 = arith.constant 0.000000e+00 : f32
    %46 = vector.broadcast %cst_16 : f32 to vector<16x128xf32>
    %47 = arith.select %22, %45, %46 : vector<16x128xi1>, vector<16x128xf32>
    %48 = arith.truncf %47 : vector<16x128xf32> to vector<16x128xbf16>
    %49 = arith.truncf %44 : vector<16x128xf32> to vector<16x128xbf16>
    %c15_i32_17 = arith.constant 15 : i32
    %50 = tpu.dynamic_rotate %44 by %c15_i32_17 dim 0 : vector<16x128xf32>, i32 -> vector<16x128xf32>
    %cst_18 = arith.constant 0.000000e+00 : f32
    %51 = vector.broadcast %cst_18 : f32 to vector<16x128xf32>
    %52 = arith.select %26, %50, %51 : vector<16x128xi1>, vector<16x128xf32>
    %53 = arith.truncf %52 : vector<16x128xf32> to vector<16x128xbf16>
    %54 = tpu.concatenate %48, %49, %53 in 1 : vector<16x128xbf16>, vector<16x128xbf16>, vector<16x128xbf16> -> vector<16x384xbf16>
    %c0_19 = arith.constant 0 : index
    %c0_20 = arith.constant 0 : index
    %c0_21 = arith.constant 0 : index
    %55 = vector.load %arg4[%c0_19, %c0_20, %c0_21] : memref<6x384x128xbf16, #tpu.memory_space<vmem>>, vector<1x384x128xbf16>
    %56 = vector.shape_cast %55 : vector<1x384x128xbf16> to vector<384x128xbf16>
    %cst_22 = arith.constant dense<0.000000e+00> : vector<16x128xf32>
    %57 = tpu.matmul %54, %56, %cst_22 {dimension_numbers = #tpu.dot_dimension_numbers<[1], [0], [0], [1], [0, 0, 1, 1], [], []>} : vector<16x384xbf16>, vector<384x128xbf16>, vector<16x128xf32> -> vector<16x128xf32>
    %c0_23 = arith.constant 0 : index
    %c0_24 = arith.constant 0 : index
    %c0_25 = arith.constant 0 : index
    %58 = vector.load %arg5[%c0_23, %c0_24, %c0_25] : memref<6x1x128xf32, #tpu.memory_space<vmem>>, vector<1x1x128xf32>
    %59 = vector.shape_cast %58 : vector<1x1x128xf32> to vector<1x128xf32>
    %60 = vector.broadcast %59 : vector<1x128xf32> to vector<16x128xf32>
    %61 = arith.addf %57, %60 : vector<16x128xf32>
    %cst_26 = arith.constant 0.000000e+00 : f32
    %62 = vector.broadcast %cst_26 : f32 to vector<16x128xf32>
    %63 = arith.maximumf %61, %62 : vector<16x128xf32>
    %64 = arith.addf %44, %63 : vector<16x128xf32>
    %c1_i32_27 = arith.constant 1 : i32
    %65 = tpu.dynamic_rotate %64 by %c1_i32_27 dim 0 : vector<16x128xf32>, i32 -> vector<16x128xf32>
    %cst_28 = arith.constant 0.000000e+00 : f32
    %66 = vector.broadcast %cst_28 : f32 to vector<16x128xf32>
    %67 = arith.select %22, %65, %66 : vector<16x128xi1>, vector<16x128xf32>
    %68 = arith.truncf %67 : vector<16x128xf32> to vector<16x128xbf16>
    %69 = arith.truncf %64 : vector<16x128xf32> to vector<16x128xbf16>
    %c15_i32_29 = arith.constant 15 : i32
    %70 = tpu.dynamic_rotate %64 by %c15_i32_29 dim 0 : vector<16x128xf32>, i32 -> vector<16x128xf32>
    %cst_30 = arith.constant 0.000000e+00 : f32
    %71 = vector.broadcast %cst_30 : f32 to vector<16x128xf32>
    %72 = arith.select %26, %70, %71 : vector<16x128xi1>, vector<16x128xf32>
    %73 = arith.truncf %72 : vector<16x128xf32> to vector<16x128xbf16>
    %74 = tpu.concatenate %68, %69, %73 in 1 : vector<16x128xbf16>, vector<16x128xbf16>, vector<16x128xbf16> -> vector<16x384xbf16>
    %c1 = arith.constant 1 : index
    %c0_31 = arith.constant 0 : index
    %c0_32 = arith.constant 0 : index
    %75 = vector.load %arg4[%c1, %c0_31, %c0_32] : memref<6x384x128xbf16, #tpu.memory_space<vmem>>, vector<1x384x128xbf16>
    %76 = vector.shape_cast %75 : vector<1x384x128xbf16> to vector<384x128xbf16>
    %cst_33 = arith.constant dense<0.000000e+00> : vector<16x128xf32>
    %77 = tpu.matmul %74, %76, %cst_33 {dimension_numbers = #tpu.dot_dimension_numbers<[1], [0], [0], [1], [0, 0, 1, 1], [], []>} : vector<16x384xbf16>, vector<384x128xbf16>, vector<16x128xf32> -> vector<16x128xf32>
    %c1_34 = arith.constant 1 : index
    %c0_35 = arith.constant 0 : index
    %c0_36 = arith.constant 0 : index
    %78 = vector.load %arg5[%c1_34, %c0_35, %c0_36] : memref<6x1x128xf32, #tpu.memory_space<vmem>>, vector<1x1x128xf32>
    %79 = vector.shape_cast %78 : vector<1x1x128xf32> to vector<1x128xf32>
    %80 = vector.broadcast %79 : vector<1x128xf32> to vector<16x128xf32>
    %81 = arith.addf %77, %80 : vector<16x128xf32>
    %cst_37 = arith.constant 0.000000e+00 : f32
    %82 = vector.broadcast %cst_37 : f32 to vector<16x128xf32>
    %83 = arith.maximumf %81, %82 : vector<16x128xf32>
    %84 = arith.addf %64, %83 : vector<16x128xf32>
    %c1_i32_38 = arith.constant 1 : i32
    %85 = tpu.dynamic_rotate %84 by %c1_i32_38 dim 0 : vector<16x128xf32>, i32 -> vector<16x128xf32>
    %cst_39 = arith.constant 0.000000e+00 : f32
    %86 = vector.broadcast %cst_39 : f32 to vector<16x128xf32>
    %87 = arith.select %22, %85, %86 : vector<16x128xi1>, vector<16x128xf32>
    %88 = arith.truncf %87 : vector<16x128xf32> to vector<16x128xbf16>
    %89 = arith.truncf %84 : vector<16x128xf32> to vector<16x128xbf16>
    %c15_i32_40 = arith.constant 15 : i32
    %90 = tpu.dynamic_rotate %84 by %c15_i32_40 dim 0 : vector<16x128xf32>, i32 -> vector<16x128xf32>
    %cst_41 = arith.constant 0.000000e+00 : f32
    %91 = vector.broadcast %cst_41 : f32 to vector<16x128xf32>
    %92 = arith.select %26, %90, %91 : vector<16x128xi1>, vector<16x128xf32>
    %93 = arith.truncf %92 : vector<16x128xf32> to vector<16x128xbf16>
    %94 = tpu.concatenate %88, %89, %93 in 1 : vector<16x128xbf16>, vector<16x128xbf16>, vector<16x128xbf16> -> vector<16x384xbf16>
    %c2 = arith.constant 2 : index
    %c0_42 = arith.constant 0 : index
    %c0_43 = arith.constant 0 : index
    %95 = vector.load %arg4[%c2, %c0_42, %c0_43] : memref<6x384x128xbf16, #tpu.memory_space<vmem>>, vector<1x384x128xbf16>
    %96 = vector.shape_cast %95 : vector<1x384x128xbf16> to vector<384x128xbf16>
    %cst_44 = arith.constant dense<0.000000e+00> : vector<16x128xf32>
    %97 = tpu.matmul %94, %96, %cst_44 {dimension_numbers = #tpu.dot_dimension_numbers<[1], [0], [0], [1], [0, 0, 1, 1], [], []>} : vector<16x384xbf16>, vector<384x128xbf16>, vector<16x128xf32> -> vector<16x128xf32>
    %c2_45 = arith.constant 2 : index
    %c0_46 = arith.constant 0 : index
    %c0_47 = arith.constant 0 : index
    %98 = vector.load %arg5[%c2_45, %c0_46, %c0_47] : memref<6x1x128xf32, #tpu.memory_space<vmem>>, vector<1x1x128xf32>
    %99 = vector.shape_cast %98 : vector<1x1x128xf32> to vector<1x128xf32>
    %100 = vector.broadcast %99 : vector<1x128xf32> to vector<16x128xf32>
    %101 = arith.addf %97, %100 : vector<16x128xf32>
    %cst_48 = arith.constant 0.000000e+00 : f32
    %102 = vector.broadcast %cst_48 : f32 to vector<16x128xf32>
    %103 = arith.maximumf %101, %102 : vector<16x128xf32>
    %104 = arith.addf %84, %103 : vector<16x128xf32>
    %c1_i32_49 = arith.constant 1 : i32
    %105 = tpu.dynamic_rotate %104 by %c1_i32_49 dim 0 : vector<16x128xf32>, i32 -> vector<16x128xf32>
    %cst_50 = arith.constant 0.000000e+00 : f32
    %106 = vector.broadcast %cst_50 : f32 to vector<16x128xf32>
    %107 = arith.select %22, %105, %106 : vector<16x128xi1>, vector<16x128xf32>
    %108 = arith.truncf %107 : vector<16x128xf32> to vector<16x128xbf16>
    %109 = arith.truncf %104 : vector<16x128xf32> to vector<16x128xbf16>
    %c15_i32_51 = arith.constant 15 : i32
    %110 = tpu.dynamic_rotate %104 by %c15_i32_51 dim 0 : vector<16x128xf32>, i32 -> vector<16x128xf32>
    %cst_52 = arith.constant 0.000000e+00 : f32
    %111 = vector.broadcast %cst_52 : f32 to vector<16x128xf32>
    %112 = arith.select %26, %110, %111 : vector<16x128xi1>, vector<16x128xf32>
    %113 = arith.truncf %112 : vector<16x128xf32> to vector<16x128xbf16>
    %114 = tpu.concatenate %108, %109, %113 in 1 : vector<16x128xbf16>, vector<16x128xbf16>, vector<16x128xbf16> -> vector<16x384xbf16>
    %c3 = arith.constant 3 : index
    %c0_53 = arith.constant 0 : index
    %c0_54 = arith.constant 0 : index
    %115 = vector.load %arg4[%c3, %c0_53, %c0_54] : memref<6x384x128xbf16, #tpu.memory_space<vmem>>, vector<1x384x128xbf16>
    %116 = vector.shape_cast %115 : vector<1x384x128xbf16> to vector<384x128xbf16>
    %cst_55 = arith.constant dense<0.000000e+00> : vector<16x128xf32>
    %117 = tpu.matmul %114, %116, %cst_55 {dimension_numbers = #tpu.dot_dimension_numbers<[1], [0], [0], [1], [0, 0, 1, 1], [], []>} : vector<16x384xbf16>, vector<384x128xbf16>, vector<16x128xf32> -> vector<16x128xf32>
    %c3_56 = arith.constant 3 : index
    %c0_57 = arith.constant 0 : index
    %c0_58 = arith.constant 0 : index
    %118 = vector.load %arg5[%c3_56, %c0_57, %c0_58] : memref<6x1x128xf32, #tpu.memory_space<vmem>>, vector<1x1x128xf32>
    %119 = vector.shape_cast %118 : vector<1x1x128xf32> to vector<1x128xf32>
    %120 = vector.broadcast %119 : vector<1x128xf32> to vector<16x128xf32>
    %121 = arith.addf %117, %120 : vector<16x128xf32>
    %cst_59 = arith.constant 0.000000e+00 : f32
    %122 = vector.broadcast %cst_59 : f32 to vector<16x128xf32>
    %123 = arith.maximumf %121, %122 : vector<16x128xf32>
    %124 = arith.addf %104, %123 : vector<16x128xf32>
    %c1_i32_60 = arith.constant 1 : i32
    %125 = tpu.dynamic_rotate %124 by %c1_i32_60 dim 0 : vector<16x128xf32>, i32 -> vector<16x128xf32>
    %cst_61 = arith.constant 0.000000e+00 : f32
    %126 = vector.broadcast %cst_61 : f32 to vector<16x128xf32>
    %127 = arith.select %22, %125, %126 : vector<16x128xi1>, vector<16x128xf32>
    %128 = arith.truncf %127 : vector<16x128xf32> to vector<16x128xbf16>
    %129 = arith.truncf %124 : vector<16x128xf32> to vector<16x128xbf16>
    %c15_i32_62 = arith.constant 15 : i32
    %130 = tpu.dynamic_rotate %124 by %c15_i32_62 dim 0 : vector<16x128xf32>, i32 -> vector<16x128xf32>
    %cst_63 = arith.constant 0.000000e+00 : f32
    %131 = vector.broadcast %cst_63 : f32 to vector<16x128xf32>
    %132 = arith.select %26, %130, %131 : vector<16x128xi1>, vector<16x128xf32>
    %133 = arith.truncf %132 : vector<16x128xf32> to vector<16x128xbf16>
    %134 = tpu.concatenate %128, %129, %133 in 1 : vector<16x128xbf16>, vector<16x128xbf16>, vector<16x128xbf16> -> vector<16x384xbf16>
    %c4 = arith.constant 4 : index
    %c0_64 = arith.constant 0 : index
    %c0_65 = arith.constant 0 : index
    %135 = vector.load %arg4[%c4, %c0_64, %c0_65] : memref<6x384x128xbf16, #tpu.memory_space<vmem>>, vector<1x384x128xbf16>
    %136 = vector.shape_cast %135 : vector<1x384x128xbf16> to vector<384x128xbf16>
    %cst_66 = arith.constant dense<0.000000e+00> : vector<16x128xf32>
    %137 = tpu.matmul %134, %136, %cst_66 {dimension_numbers = #tpu.dot_dimension_numbers<[1], [0], [0], [1], [0, 0, 1, 1], [], []>} : vector<16x384xbf16>, vector<384x128xbf16>, vector<16x128xf32> -> vector<16x128xf32>
    %c4_67 = arith.constant 4 : index
    %c0_68 = arith.constant 0 : index
    %c0_69 = arith.constant 0 : index
    %138 = vector.load %arg5[%c4_67, %c0_68, %c0_69] : memref<6x1x128xf32, #tpu.memory_space<vmem>>, vector<1x1x128xf32>
    %139 = vector.shape_cast %138 : vector<1x1x128xf32> to vector<1x128xf32>
    %140 = vector.broadcast %139 : vector<1x128xf32> to vector<16x128xf32>
    %141 = arith.addf %137, %140 : vector<16x128xf32>
    %cst_70 = arith.constant 0.000000e+00 : f32
    %142 = vector.broadcast %cst_70 : f32 to vector<16x128xf32>
    %143 = arith.maximumf %141, %142 : vector<16x128xf32>
    %144 = arith.addf %124, %143 : vector<16x128xf32>
    %c1_i32_71 = arith.constant 1 : i32
    %145 = tpu.dynamic_rotate %144 by %c1_i32_71 dim 0 : vector<16x128xf32>, i32 -> vector<16x128xf32>
    %cst_72 = arith.constant 0.000000e+00 : f32
    %146 = vector.broadcast %cst_72 : f32 to vector<16x128xf32>
    %147 = arith.select %22, %145, %146 : vector<16x128xi1>, vector<16x128xf32>
    %148 = arith.truncf %147 : vector<16x128xf32> to vector<16x128xbf16>
    %149 = arith.truncf %144 : vector<16x128xf32> to vector<16x128xbf16>
    %c15_i32_73 = arith.constant 15 : i32
    %150 = tpu.dynamic_rotate %144 by %c15_i32_73 dim 0 : vector<16x128xf32>, i32 -> vector<16x128xf32>
    %cst_74 = arith.constant 0.000000e+00 : f32
    %151 = vector.broadcast %cst_74 : f32 to vector<16x128xf32>
    %152 = arith.select %26, %150, %151 : vector<16x128xi1>, vector<16x128xf32>
    %153 = arith.truncf %152 : vector<16x128xf32> to vector<16x128xbf16>
    %154 = tpu.concatenate %148, %149, %153 in 1 : vector<16x128xbf16>, vector<16x128xbf16>, vector<16x128xbf16> -> vector<16x384xbf16>
    %c5 = arith.constant 5 : index
    %c0_75 = arith.constant 0 : index
    %c0_76 = arith.constant 0 : index
    %155 = vector.load %arg4[%c5, %c0_75, %c0_76] : memref<6x384x128xbf16, #tpu.memory_space<vmem>>, vector<1x384x128xbf16>
    %156 = vector.shape_cast %155 : vector<1x384x128xbf16> to vector<384x128xbf16>
    %cst_77 = arith.constant dense<0.000000e+00> : vector<16x128xf32>
    %157 = tpu.matmul %154, %156, %cst_77 {dimension_numbers = #tpu.dot_dimension_numbers<[1], [0], [0], [1], [0, 0, 1, 1], [], []>} : vector<16x384xbf16>, vector<384x128xbf16>, vector<16x128xf32> -> vector<16x128xf32>
    %c5_78 = arith.constant 5 : index
    %c0_79 = arith.constant 0 : index
    %c0_80 = arith.constant 0 : index
    %158 = vector.load %arg5[%c5_78, %c0_79, %c0_80] : memref<6x1x128xf32, #tpu.memory_space<vmem>>, vector<1x1x128xf32>
    %159 = vector.shape_cast %158 : vector<1x1x128xf32> to vector<1x128xf32>
    %160 = vector.broadcast %159 : vector<1x128xf32> to vector<16x128xf32>
    %161 = arith.addf %157, %160 : vector<16x128xf32>
    %cst_81 = arith.constant 0.000000e+00 : f32
    %162 = vector.broadcast %cst_81 : f32 to vector<16x128xf32>
    %163 = arith.maximumf %161, %162 : vector<16x128xf32>
    %164 = arith.addf %144, %163 : vector<16x128xf32>
    %165 = arith.truncf %164 : vector<16x128xf32> to vector<16x128xbf16>
    %c0_82 = arith.constant 0 : index
    %c0_83 = arith.constant 0 : index
    %166 = vector.load %arg6[%c0_82, %c0_83] : memref<128x128xbf16, #tpu.memory_space<vmem>>, vector<128x128xbf16>
    %cst_84 = arith.constant dense<0.000000e+00> : vector<16x128xf32>
    %167 = tpu.matmul %165, %166, %cst_84 {dimension_numbers = #tpu.dot_dimension_numbers<[1], [0], [0], [1], [0, 0, 1, 1], [], []>} : vector<16x128xbf16>, vector<128x128xbf16>, vector<16x128xf32> -> vector<16x128xf32>
    %c0_85 = arith.constant 0 : index
    %c0_86 = arith.constant 0 : index
    %168 = vector.load %arg7[%c0_85, %c0_86] : memref<1x128xf32, #tpu.memory_space<vmem>>, vector<1x128xf32>
    %169 = vector.broadcast %168 : vector<1x128xf32> to vector<16x128xf32>
    %170 = arith.addf %167, %169 : vector<16x128xf32>
    %cst_87 = arith.constant 0.000000e+00 : f32
    %171 = vector.broadcast %cst_87 : f32 to vector<16x128xf32>
    %172 = arith.maximumf %170, %171 : vector<16x128xf32>
    %173 = vector.shape_cast %172 : vector<16x128xf32> to vector<1x16x128xf32>
    %c0_88 = arith.constant 0 : index
    %c0_89 = arith.constant 0 : index
    %c0_90 = arith.constant 0 : index
    %174 = vector.load %arg8[%c0_88, %c0_89, %c0_90] : memref<1x16x128xf32, #tpu.memory_space<vmem>>, vector<1x16x128xf32>
    tpu.vector_store %arg8[%c0_88, %c0_89, %c0_90], %173 {strides = array<i32>} : memref<1x16x128xf32, #tpu.memory_space<vmem>>, vector<1x16x128xf32>,
    return
  }
  func.func @transform_0(%arg0: i32) -> (i32, i32, i32) {
    %c0_i32 = arith.constant 0 : i32
    %c0_i32_0 = arith.constant 0 : i32
    %c0_i32_1 = arith.constant 0 : i32
    return %arg0, %c0_i32, %c0_i32_0 : i32, i32, i32
  }
  func.func @transform_1(%arg0: i32) -> (i32, i32) {
    %c0_i32 = arith.constant 0 : i32
    %c0_i32_0 = arith.constant 0 : i32
    %c0_i32_1 = arith.constant 0 : i32
    return %c0_i32, %c0_i32_0 : i32, i32
  }
  func.func @transform_2(%arg0: i32) -> (i32, i32) {
    %c0_i32 = arith.constant 0 : i32
    %c0_i32_0 = arith.constant 0 : i32
    %c0_i32_1 = arith.constant 0 : i32
    return %c0_i32, %c0_i32_0 : i32, i32
  }
  func.func @transform_3(%arg0: i32) -> (i32, i32, i32) {
    %c0_i32 = arith.constant 0 : i32
    %c0_i32_0 = arith.constant 0 : i32
    %c0_i32_1 = arith.constant 0 : i32
    %c0_i32_2 = arith.constant 0 : i32
    return %c0_i32, %c0_i32_0, %c0_i32_1 : i32, i32, i32
  }
  func.func @transform_4(%arg0: i32) -> (i32, i32, i32) {
    %c0_i32 = arith.constant 0 : i32
    %c0_i32_0 = arith.constant 0 : i32
    %c0_i32_1 = arith.constant 0 : i32
    %c0_i32_2 = arith.constant 0 : i32
    return %c0_i32, %c0_i32_0, %c0_i32_1 : i32, i32, i32
  }
  func.func @transform_5(%arg0: i32) -> (i32, i32) {
    %c0_i32 = arith.constant 0 : i32
    %c0_i32_0 = arith.constant 0 : i32
    %c0_i32_1 = arith.constant 0 : i32
    return %c0_i32, %c0_i32_0 : i32, i32
  }
  func.func @transform_6(%arg0: i32) -> (i32, i32) {
    %c0_i32 = arith.constant 0 : i32
    %c0_i32_0 = arith.constant 0 : i32
    %c0_i32_1 = arith.constant 0 : i32
    return %c0_i32, %c0_i32_0 : i32, i32
  }
  func.func @transform_7(%arg0: i32) -> (i32, i32, i32) {
    %c0_i32 = arith.constant 0 : i32
    %c0_i32_0 = arith.constant 0 : i32
    %c0_i32_1 = arith.constant 0 : i32
    return %arg0, %c0_i32, %c0_i32_0 : i32, i32, i32
  }
}

</mosaic_0001>

<bundles_post_ra>
// kernel: tpu_custom_call.1
= control target key start
LH: loop header
LB: loop body
LE: loop exit
PB: predicated region body
PF: predicated region fallthrough
CT: control target
= control target key end

     0   :  { %s4039_s0 = inlined_call_operand.hbm [shape: bf16[2,16,64], index: 0, kind: input, shape index: {}]   ;;  %s4040_s1 = inlined_call_operand.hbm [shape: bf16[64,384], index: 1, kind: input, shape index: {}]   ;;  %s4041_s2 = inlined_call_operand.vmem [shape: f32[1,128], index: 2, kind: input, shape index: {}]   ;;  %s4042_s3 = inlined_call_operand.hbm [shape: bf16[6,384,128], index: 3, kind: input, shape index: {}]   ;;  %s4043_s4 = inlined_call_operand.hbm [shape: f32[6,1,128], index: 4, kind: input, shape index: {}]   ;;  %s4044_s5 = inlined_call_operand.hbm [shape: bf16[128,128], index: 5, kind: input, shape index: {}]   ;;  %s4045_s6 = inlined_call_operand.vmem [shape: f32[1,128], index: 6, kind: input, shape index: {}]   ;;  %s4046_s7 = inlined_call_operand.hbm [shape: f32[2,16,128], index: 7, kind: output, shape index: {}]  }
   0x1   :  { %4049 = sst [smem:[#allocation16_spill]] %s4040_s1 }
   0x2   :  { %12 = vsyncpa [#allocation3], 0 }
   0x3   :  { %14 = vsyncpa [#allocation3 + $0x1], 0 }
   0x4   :  { %15 = vsyncpa [#allocation6], 0 }
   0x5   :  { %16 = vsyncpa [#allocation9], 0 }
   0x6   :  { %17 = vsyncpa [#allocation4], 0 }
   0x7   :  { %19 = vsyncpa [#allocation4 + $0x1], 0  ;;  %s3689_s24 = smov 0   ;;  %s3691_s25 = smov 0  }
   0x8   :  { %s3693_s26 = smov 0   ;;  %s3695_s27 = smov 0  }
   0x9 LB: > { %s3710_s28 = sadd.s32 4294967295, %s3635_s27   ;;  %s2456_s29 = sadd.s32 4294967294, %s3635_s27   ;;  %s3635_s27 = sphi %s3695_s27, %s4067_s27   ;;  %s3631_s26 = sphi %s3693_s26, %s4066_s26   ;;  %s3627_s25 = sphi %s3691_s25, %s4065_s25   ;;  %s3623_s24 = sphi %s3689_s24, %s4064_s24  }
   0xa   : > { %p45_p0 = scmp.ne.s32.totalorder %s3627_s25, %s3623_s24  ;;  %p46_p1 = scmp.eq.s32.totalorder %s3710_s28, 0 }
   0xb   : > { %p195_p2 = scmp.eq.s32.totalorder %s3710_s28, 1  ;;  %p201_p3 = scmp.eq.s32.totalorder %s2456_s29, 1 }
   0xc   : > { %p3719_p4 = por %p46_p1, %p45_p0  ;;  %p2457_p5 = scmp.ge.s32.totalorder %s3635_s27, 1 }
   0xd   : > { %p3724_p6 = por %p201_p3, %p45_p0  ;;  %p208_p7 = scmp.lt.s32.totalorder %s3635_s27, 3 }
   0xe   : > { %s4052_s1 = sld [smem:[#allocation16_spill]]  ;;  %s3637_s13 = smov [#allocation5]  }
   0xf   : > { %p3732_p8 = pnand %p2457_p5, %p208_p7  ;;  %s221_s14 = sshll.u32 %s3637_s13, 4  ;;  %s222_s14 = int_to_ptr.vmem [resolvable:$true] %s221_s14 }
  0x10   : > { %s250_s18 = sshll.u32 %s4043_s4, 4  ;;  %s3638_s19 = smov 192   ;;  %s251_s18 = int_to_ptr.hbm [resolvable:$true] %s250_s18 }
  0x11   : > { %p3328_p9 = pneg %p3732_p8  ;;  %s3639_s20 = smov 12  }
  0x12   : > { %s3640_s21 = smov [#allocation8]   ;;  %s3641_s23 = smov 16  }
  0x13   : > { %p3740_p10 = pnand %p3328_p9, %p46_p1  ;;  %s252_s22 = sshll.u32 %s3640_s21, 4  ;;  %s253_s22 = int_to_ptr.vmem [resolvable:$true] %s252_s22 }
  0x14   : > { %s219_s11 = sshll.u32 %s4052_s1, 4  ;;  %s3642_s29 = smov 1   ;;  %s220_s11 = int_to_ptr.hbm [resolvable:$true] %s219_s11 }
  0x15   : > { %3331 = dma.hbm_to_vmem [thread:$0]  (!%p3740_p10), %s220_s11, 1536, %s222_s14, [#allocation6], %s3638_s19, %s3638_s19, %s3639_s20  }
  0x16   : > { %3337 = dma.hbm_to_vmem [thread:$0]  (!%p3740_p10), %s251_s18, 96, %s253_s22, [#allocation9], %s3641_s23, %s3641_s23, %s3642_s29  }
  0x17   : > { %s236_s13 = sshll.u32 %s4042_s3, 4  ;;  %s3643_s16 = smov [#allocation7]   ;;  %s237_s13 = int_to_ptr.hbm [resolvable:$true] %s236_s13 }
  0x18   : > { %s238_s11 = sshll.u32 %s3643_s16, 4  ;;  %s264_s19 = sshll.u32 %s4044_s5, 4  ;;  %s239_s11 = int_to_ptr.vmem [resolvable:$true] %s238_s11  ;;  %s265_s19 = int_to_ptr.hbm [resolvable:$true] %s264_s19 }
  0x19   : > { %s4047_s18 = smov 64   ;;  %s4048_s20 = smov 4  }
  0x1a   : > { %3334 = dma.hbm_to_vmem [thread:$0]  (!%p3740_p10), %s237_s13, 18432, %s239_s11, [#allocation6], %s4047_s18, %s4047_s18, %s4048_s20  }
  0x1b   : > { %s3646_s21 = smov [#allocation10]   ;;  %s3769_s23 = sadd.s32 1, %s3635_s27  }
  0x1c   : > { %s266_s22 = sshll.u32 %s3646_s21, 4  ;;  %s32_s29 = sadd.s32 1, %s3631_s26  ;;  %s267_s22 = int_to_ptr.vmem [resolvable:$true] %s266_s22 }
  0x1d   : > { %3340 = dma.hbm_to_vmem [thread:$0]  (!%p3740_p10), %s265_s19, 1024, %s267_s22, [#allocation9], %s4047_s18, %s4047_s18, %s4048_s20  }
  0x1e   : > { %s29_s9 = ssub.s32 %s3635_s27, %s3769_s23  ;;  %p39_p12 = scmp.ne.s32.totalorder %s3631_s26, %s3627_s25 }
  0x1f   : > { %p30_p13 = scmp.eq.s32.totalorder %s29_s9, 0  ;;  %p40_p0 = scmp.eq.s32.totalorder %s3635_s27, 0 }
  0x20   : > { %p3779_p3 = por %p195_p2, %p39_p12  ;;  %p3353_p5 = scmp.lt.s32.totalorder %s3635_s27, 2 }
  0x21   : > { %s3785_s13 = scalar_select %p30_p13, %s3631_s26, %s32_s29  }
  0x22   : > { %p41_p7 = por %p40_p0, %p39_p12  ;;  %s283_s15 = sand.u32 1, %s3631_s26  }
  0x23   : > { %s2463_s16 = sshll.u32 %s283_s15, 3  ;;  %s3141_s11 = sshll.u32 %s3635_s27, 3 }
  0x24   : > { %s292_s19 = scalar_lea.hbm %s4039_s0, %s3141_s11  ;;  %s287_s21 = scalar_lea.vmem [#allocation2], %s2463_s16 }
  0x25   : > { %s295_s22 = sshll.u32 %s287_s21, 4  ;;  %s293_s9 = sshll.u32 %s292_s19, 4  ;;  %s296_s22 = int_to_ptr.vmem [resolvable:$true] %s295_s22  ;;  %s294_s9 = int_to_ptr.hbm [resolvable:$true] %s293_s9 }
  0x26   : > { %p3792_p2 = pnand %p3353_p5, %p41_p7  ;;  %s284_s29 = scalar_lea.sflag [#allocation3], %s283_s15 }
  0x27   : > { %s3531_s20 = sshra.s32 %s294_s9, 4  ;;  %s3538_s14 = scalar_lea.hbm %s4039_s0, 16  ;;  %s3532_s20 = int_to_ptr.hbm [resolvable:$true] %s3531_s20 }
  0x28   : > { %s3533_s1 = scalar_lea.hbm %s3532_s20, 8  ;;  %p3535_p10 = pneg %p3792_p2 }
  0x29   : > { %p3534_p9 = scmp.ne.s32.totalorder %s3532_s20, %s3533_s1  ;;  %p3539_p0 = scmp.lt.s32.totalorder %s3532_s20, %s4039_s0 }
  0x2a   : > { %p3540_p5 = scmp.lt.s32.totalorder %s3538_s14, %s3533_s1 }
  0x2b   : > { %p3536_p12 = pnand %p3535_p10, %p3534_p9 }
  0x2c   : > { %p3541_p7 = por %p3540_p5, %p3539_p0 }
  0x2d   : > { %p3537_p13 = pneg %p3536_p12 }
  0x2f   : > { %p3542_p11 = pnand %p3541_p7, %p3537_p13 }
  0x31   : > { %3545 = shalt.err (!%p3542_p11)
}
  0x32   : > { %s4057_s15 = smov 4   ;;  %s4058_s21 = smov 64  }
  0x33   : > { %3344 = dma.hbm_to_vmem [thread:$0]  (!%p3792_p2), %s294_s9, 128, %s296_s22, %s284_s29, %s4058_s21, %s4058_s21, %s4057_s15  }
  0x34   : > { %307 = sbr.rel (%p3732_p8) target bundleno = 1344 (0x540), region = 48  ;;  %s3812_s11 = sand.u32 (!%p3732_p8), 1, %s3627_s25  }
  0x35   : > { %s2467_s20 = sshll.u32 (!%p3732_p8), %s3812_s11, 3  ;;  %s310_s1 = scalar_lea.sflag (!%p3732_p8), [#allocation3], %s3812_s11 }
  0x36   : > { %s3816_s16 = scalar_lea.vmem (!%p3732_p8), [#allocation2], %s2467_s20 }
  0x39   : > { %3606 = dma.done.wait (%p3719_p4), %s310_s1, 128  }
  0x3a   : > { %3608 = vsyncadd (%p3719_p4), %s310_s1, 4294967168 }
  0x3b   : > { %3610 = dma.done.wait (%p46_p1), [#allocation6], 19968  }
  0x3c   : > { %3612 = vsyncadd (%p46_p1), [#allocation6], 4294947328 }
  0x3d   : > { %3614 = dma.done.wait (%p46_p1), [#allocation9], 1120  }
  0x3e   : > { %3616 = vsyncadd (%p46_p1), [#allocation9], 4294966176  ;;  %v2515_v0 = vld [vmem:[#allocation5 + $0x48] sm:$0xf]  ;;  %v3153_v1 = vld [vmem:[#allocation5 + $0x50] sm:$0xf0]  ;;  %v368_v60 = vlaneseq }
  0x3f   : > { %v2503_v2 = vld [vmem:[#allocation5 + $0x30] sm:$0xf]  ;;  %v2516_v3 = vor.u32 %v3153_v1, %v2515_v0  ;;  %v3150_v4 = vld [vmem:[#allocation5 + $0x38] sm:$0xf0]  ;;  %v3152_v5 = vld [vmem:[#allocation5 + $0x4c] sm:$0xf] }
  0x40   : > { %v2517_v6 = vld [vmem:[#allocation5 + $0x54] sm:$0xf0]  ;;  %v2504_v7 = vor.u32 %v3150_v4, %v2503_v2  ;;  %v3149_v9 = vld [vmem:[#allocation5 + $0x34] sm:$0xf]  ;;  %v2505_v10 = vld [vmem:[#allocation5 + $0x3c] sm:$0xf0] }
  0x41   : > { %500 = vmatpush.bf16.msra.mxu2 %v2516_v3  ;;  %v2520_v8 = vor.u32 %v3152_v5, %v2517_v6  ;;  %v2491_v11 = vld [vmem:[#allocation5 + $0x18] sm:$0xf]  ;;  %v3147_v12 = vld [vmem:[#allocation5 + $0x20] sm:$0xf0]  ;;  %v2508_v13 = vor.u32 %v3149_v9, %v2505_v10  ;;  %v2479_v14 = vld [vmem:[#allocation5] sm:$0xf] }
  0x42   : > { %v3146_v15 = vld [vmem:[#allocation5 + $0x1c] sm:$0xf]  ;;  %v2493_v16 = vld [vmem:[#allocation5 + $0x24] sm:$0xf0]  ;;  %v2492_v17 = vor.u32 %v3147_v12, %v2491_v11  ;;  %v3144_v18 = vld [vmem:[#allocation5 + $0x8] sm:$0xf0] }
  0x43   : > { %514 = vmatpush.bf16.msra.mxu1 %v2520_v8  ;;  %v2523_v19 = vld [vmem:[#allocation5 + $0x50] sm:$0xf]  ;;  %v3154_v20 = vld [vmem:[#allocation5 + $0x58] sm:$0xf0]  ;;  %v3143_v21 = vld [vmem:[#allocation5 + $0x4] sm:$0xf]  ;;  %v2496_v23 = vor.u32 %v3146_v15, %v2493_v16  ;;  %v2480_v24 = vor.u32 %v3144_v18, %v2479_v14 }
  0x44   : > { %v2481_v22 = vld [vmem:[#allocation5 + $0xc] sm:$0xf0]  ;;  %v2524_v25 = vor.u32 %v3154_v20, %v2523_v19  ;;  %v2511_v26 = vld [vmem:[#allocation5 + $0x38] sm:$0xf]  ;;  %v3151_v27 = vld [vmem:[#allocation5 + $0x40] sm:$0xf0] }
  0x45   : > { %501 = vmatpush.bf16.msra.mxu2 %v2504_v7  ;;  %v2484_v28 = vor.u32 %v3143_v21, %v2481_v22  ;;  %v3142_v29 = vld [vmem:[%s3816_s16] sm:$0xff]  ;;  %vm492_vm0 = vcmask 523264   ;;  %v2512_v30 = vor.u32 %v3151_v27, %v2511_v26  ;;  %v2499_v31 = vld [vmem:[#allocation5 + $0x20] sm:$0xf]  ;;  %v3148_v32 = vld [vmem:[#allocation5 + $0x28] sm:$0xf0] }
  0x46   : > { %v2500_v33 = vor.u32 %v3148_v32, %v2499_v31  ;;  %v2487_v34 = vld [vmem:[#allocation5 + $0x8] sm:$0xf]  ;;  %v3145_v35 = vld [vmem:[#allocation5 + $0x10] sm:$0xf0]  ;;  %v3170_v37 = vld [vmem:[#allocation7 + $0x78] sm:$0xff]  ;;  %v3831_v0 = vshrl.u32 %v368_v60, 7 }
  0x47   : > { %515 = vmatpush.bf16.msra.mxu1 %v2508_v13  ;;  %v2488_v36 = vor.u32 %v3145_v35, %v2487_v34  ;;  %810 = vmatpush.bf16.msra.mxu0 %v3170_v37  ;;  %v3162_v38 = vld [vmem:[#allocation7 + $0x38] sm:$0xff]  ;;  %v3169_v39 = vld [vmem:[#allocation7 + $0x70] sm:$0xff]  ;;  %v3168_v42 = vld [vmem:[#allocation7 + $0x68] sm:$0xff]  ;;  %s2472_s9 = sshll.u32 %s3812_s11, 4  ;;  %s3307_s29 = sshll.u32 %s3710_s28, 4 }
  0x48   : > { %v3178_v40 = vld [vmem:[#allocation7 + $0xb8] sm:$0xff]  ;;  %796 = vmatpush.bf16.msra.mxu3 %v3162_v38  ;;  %v3161_v41 = vld [vmem:[#allocation7 + $0x30] sm:$0xff]  ;;  %v3160_v44 = vld [vmem:[#allocation7 + $0x28] sm:$0xff]  ;;  %v375_v2 = vand.u32 15, %v3831_v0  ;;  %vm540_vm1 = vcmp.lt.s32.totalorder %v3831_v0, 1  ;;  %v370_v5 = vadd.s32 8, %v3831_v0  ;;  %s2341_s19 = scalar_lea.hbm %s4046_s7, %s3307_s29 }
  0x49   : > { %502 = vmatpush.bf16.msra.mxu2 %v2492_v17  ;;  %v3177_v43 = vld [vmem:[#allocation7 + $0xb0] sm:$0xff]  ;;  %v3167_v45 = vld [vmem:[#allocation7 + $0x60] sm:$0xff]  ;;  %v3176_v46 = vld [vmem:[#allocation7 + $0xa8] sm:$0xff]  ;;  %vm549_vm3 = vcmp.lt.s32.totalorder %v3831_v0, 7  ;;  %s364_s15 = scalar_lea.vmem [#allocation11], %s2472_s9  ;;  %s2344_s20 = sshll.u32 %s2341_s19, 4  ;;  %s2345_s20 = int_to_ptr.hbm [resolvable:$true] %s2344_s20 }
  0x4a   : > { %v3159_v47 = vld [vmem:[#allocation7 + $0x20] sm:$0xff]  ;;  %v3166_v48 = vld [vmem:[#allocation7 + $0x58] sm:$0xff]  ;;  %v3165_v51 = vld [vmem:[#allocation7 + $0x50] sm:$0xff]  ;;  %vm3836_vm2 = vcmp.ne.s32.totalorder %v375_v2, 0  ;;  %v382_v9 = vand.u32 15, %v370_v5  ;;  %s2342_s21 = sshll.u32 %s364_s15, 4  ;;  %s2343_s21 = int_to_ptr.vmem [resolvable:$true] %s2342_s21 }
  0x4b   : > { %516 = vmatpush.bf16.msra.mxu1 %v2496_v23  ;;  %811 = vmatpush.bf16.msra.mxu0 %v3169_v39  ;;  %v3175_v49 = vld [vmem:[#allocation7 + $0xa0] sm:$0xff]  ;;  %v3158_v50 = vld [vmem:[#allocation7 + $0x18] sm:$0xff]  ;;  %v3157_v54 = vld [vmem:[#allocation7 + $0x10] sm:$0xff]  ;;  %s2330_s1 = scalar_lea.sflag [#allocation4], %s3812_s11  ;;  %s3575_s16 = sshra.s32 %s2345_s20, 4  ;;  %s3576_s16 = int_to_ptr.hbm [resolvable:$true] %s3575_s16 }
  0x4c   : > { %797 = vmatpush.bf16.msra.mxu3 %v3161_v41  ;;  %v3174_v52 = vld [vmem:[#allocation7 + $0x98] sm:$0xff]  ;;  %v3164_v55 = vld [vmem:[#allocation7 + $0x48] sm:$0xff]  ;;  %v3173_v56 = vld [vmem:[#allocation7 + $0x90] sm:$0xff]  ;;  %vm3847_vm4 = vcmp.ne.s32.totalorder %v382_v9, 15  ;;  %s3577_s28 = scalar_lea.hbm %s3576_s16, 16  ;;  %s3581_s18 = scalar_lea.hbm %s4046_s7, 32 }
  0x4d   : > { %503 = vmatpush.bf16.msra.mxu2 %v2480_v24  ;;  %v3156_v57 = vld [vmem:[#allocation7 + $0x8] sm:$0xff]  ;;  %v3163_v58 = vld [vmem:[#allocation7 + $0x40] sm:$0xff]  ;;  %v3403_v18 = vld [vmem:[%s4041_s2] ss:$0 sm:$0xff]  ;;  %p3578_p1 = scmp.ne.s32.totalorder %s3576_s16, %s3577_s28  ;;  %p3582_p11 = scmp.lt.s32.totalorder %s3576_s16, %s4046_s7 }
  0x4e   : > { %v3172_v59 = vld [vmem:[#allocation7 + $0x88] sm:$0xff]  ;;  %v3155_v62 = vld [vmem:[#allocation7] sm:$0xff]  ;;  %v3201_v60 = vld [vmem:[#allocation7 + $0x170] sm:$0xff]  ;;  %p3583_p2 = scmp.lt.s32.totalorder %s3581_s18, %s3577_s28 }
  0x4f   : > { %517 = vmatpush.bf16.msra.mxu1 %v2484_v28  ;;  %812 = vmatpush.bf16.msra.mxu0 %v3168_v42  ;;  %v3171_v63 = vld [vmem:[#allocation7 + $0x80] sm:$0xff]  ;;  %v3190_v2 = vld [vmem:[#allocation7 + $0x118] sm:$0xff]  ;;  %v3189_v5 = vld [vmem:[#allocation7 + $0x110] sm:$0xff]  ;;  %p3579_p4 = pnand %p3578_p1, %p3779_p3 }
  0x50   : > { %2525 = vmatmul.msk.bf16.vlgmr.msra.gmra.mxu2 %vm492_vm0, %v3142_v29  ;;  %798 = vmatpush.bf16.msra.mxu3 %v3160_v44  ;;  %v3188_v9 = vld [vmem:[#allocation7 + $0x108] sm:$0xff]  ;;  %v3305_v7 = vld [vmem:[#allocation10 + $0x30] sm:$0xff]  ;;  %p3584_p9 = por %p3583_p2, %p3582_p11 }
  0x51   : > { %528 = vmatpush.bf16.msrb.mxu2 %v2524_v25  ;;  %v3304_v0 = vld [vmem:[#allocation10 + $0x28] sm:$0xff]  ;;  %v3301_v15 = vld [vmem:[#allocation10 + $0x10] sm:$0xff]  ;;  %p3580_p8 = pneg %p3579_p4 }
  0x52   : > { %2526 = vmatmul.msk.bf16.vlgmr.msra.gmra.mxu1 %vm492_vm0, %v3142_v29 }
  0x53   : > { %824 = vmatpush.bf16.msrb.mxu1 %v3178_v40  ;;  %813 = vmatpush.bf16.msra.mxu0 %v3167_v45  ;;  %p3585_p10 = pnand %p3584_p9, %p3580_p8 }
  0x54   : > { %799 = vmatpush.bf16.msra.mxu3 %v3159_v47 }
  0x55   : > { %529 = vmatpush.bf16.msrb.mxu2 %v2512_v30 }
  0x57   : > { %825 = vmatpush.bf16.msrb.mxu1 %v3177_v43  ;;  %814 = vmatpush.bf16.msra.mxu0 %v3166_v48 }
  0x58   : > { %800 = vmatpush.bf16.msra.mxu3 %v3158_v50 }
  0x59   : > { %530 = vmatpush.bf16.msrb.mxu2 %v2500_v33 }
  0x5b   : > { %826 = vmatpush.bf16.msrb.mxu1 %v3176_v46  ;;  %815 = vmatpush.bf16.msra.mxu0 %v3165_v51 }
  0x5c   : > { %801 = vmatpush.bf16.msra.mxu3 %v3157_v54  ;;  %v3194_v54 = vld [vmem:[#allocation7 + $0x138] sm:$0xff] }
  0x5d   : > { %531 = vmatpush.bf16.msrb.mxu2 %v2488_v36 }
  0x5f   : > { %827 = vmatpush.bf16.msrb.mxu1 %v3175_v49  ;;  %816 = vmatpush.bf16.msra.mxu0 %v3164_v55  ;;  %v3186_v55 = vld [vmem:[#allocation7 + $0xf8] sm:$0xff] }
  0x60   : > { %2527 = vmatmul.msk.bf16.vlgmr.msrb.gmra.mxu2 %vm492_vm0, %v3142_v29  ;;  %802 = vmatpush.bf16.msra.mxu3 %v3156_v57  ;;  %v3202_v57 = vld [vmem:[#allocation7 + $0x178] sm:$0xff] }
  0x61   : > { %1076 = vmatpush.bf16.msra.mxu2 %v3186_v55 }
  0x63   : > { %828 = vmatpush.bf16.msrb.mxu1 %v3174_v52  ;;  %817 = vmatpush.bf16.msra.mxu0 %v3163_v58  ;;  %v3185_v58 = vld [vmem:[#allocation7 + $0xf0] sm:$0xff] }
  0x64   : > { %803 = vmatpush.bf16.msra.mxu3 %v3155_v62  ;;  %v3191_v62 = vld [vmem:[#allocation7 + $0x120] sm:$0xff] }
  0x65   : > { %1077 = vmatpush.bf16.msra.mxu2 %v3185_v58 }
  0x67   : > { %829 = vmatpush.bf16.msrb.mxu1 %v3173_v56  ;;  %v3193_v56 = vld [vmem:[#allocation7 + $0x130] sm:$0xff]  ;;  %1104 = vmatpush.bf16.msrb.mxu0 %v3202_v57 }
  0x68   : > { %1090 = vmatpush.bf16.msrb.mxu3 %v3194_v54 }
  0x6b   : > { %830 = vmatpush.bf16.msrb.mxu1 %v3172_v59  ;;  %v3192_v59 = vld [vmem:[#allocation7 + $0x128] sm:$0xff]  ;;  %1105 = vmatpush.bf16.msrb.mxu0 %v3201_v60  ;;  %v3210_v60 = vld [vmem:[#allocation7 + $0x1b8] sm:$0xff] }
  0x6c   : > { %1091 = vmatpush.bf16.msrb.mxu3 %v3193_v56 }
  0x6f   : > { %831 = vmatpush.bf16.msrb.mxu1 %v3171_v63  ;;  %v3200_v63 = vld [vmem:[#allocation7 + $0x168] sm:$0xff] }
  0x70   : > { %1092 = vmatpush.bf16.msrb.mxu3 %v3192_v59  ;;  %1106 = vmatpush.bf16.msrb.mxu0 %v3200_v63  ;;  %v3218_v59 = vld [vmem:[#allocation7 + $0x1f8] sm:$0xff]  ;;  %v3209_v63 = vld [vmem:[#allocation7 + $0x1b0] sm:$0xff] }
  0x73   : > { %1356 = vmatpush.bf16.msra.mxu1 %v3210_v60 }
  0x74   : > { %1093 = vmatpush.bf16.msrb.mxu3 %v3191_v62  ;;  %v3226_v62 = vld [vmem:[#allocation7 + $0x238] sm:$0xff] }
  0x77   : > { %1357 = vmatpush.bf16.msra.mxu1 %v3209_v63 }
  0x78   : > { %1094 = vmatpush.bf16.msrb.mxu3 %v3190_v2  ;;  %v3225_v2 = vld [vmem:[#allocation7 + $0x230] sm:$0xff] }
  0x7c   : > { %1095 = vmatpush.bf16.msrb.mxu3 %v3189_v5  ;;  %v3224_v5 = vld [vmem:[#allocation7 + $0x228] sm:$0xff] }
  0x80   : > { %1096 = vmatpush.bf16.msrb.mxu3 %v3188_v9  ;;  %v3223_v9 = vld [vmem:[#allocation7 + $0x220] sm:$0xff] }
  0xcf   : > { %v519_v1 = vpop.f32.mrf.mxu1 }
  0xd3   : > { %v505_v53 = vpop.f32.mrf.mxu2 }
  0xd4   : > { %v538_v6 = vrot.slane %v505_v53, 7 }
  0xd7   : > { %v521_v11 = vpop.f32.mrf.mxu1 }
  0xdb   : > { %v507_v61 = vpop.f32.mrf.mxu2 }
  0xdc   : > { %v539_v3 = vrot.slane %v507_v61, 7  ;;  %v3184_v61 = vld [vmem:[#allocation7 + $0xe8] sm:$0xff] }
  0xdd   : > { %1078 = vmatpush.bf16.msra.mxu2 %v3184_v61  ;;  %v3217_v61 = vld [vmem:[#allocation7 + $0x1f0] sm:$0xff] }
  0xde   : > { %v542_v8 = vsel %vm540_vm1, %v539_v3, %v538_v6  ;;  %v541_v12 = vsel %vm540_vm1, %v538_v6, %v539_v3  ;;  %v3199_v3 = vld [vmem:[#allocation7 + $0x160] sm:$0xff]  ;;  %v3198_v6 = vld [vmem:[#allocation7 + $0x158] sm:$0xff] }
  0xdf   : > { %v543_v10 = vsel %vm3836_vm2, %v542_v8, 0.0  ;;  %v546_v19 = vadd.f32 %v541_v12, %v521_v11  ;;  %1107 = vmatpush.bf16.msrb.mxu0 %v3199_v3  ;;  %v3181_v8 = vld [vmem:[#allocation7 + $0xd0] sm:$0xff]  ;;  %v3180_v11 = vld [vmem:[#allocation7 + $0xc8] sm:$0xff]  ;;  %v3187_v12 = vld [vmem:[#allocation7 + $0x100] sm:$0xff] }
  0xe0   : > { %v545_v17 = vadd.f32 %v543_v10, %v519_v1  ;;  %v3183_v1 = vld [vmem:[#allocation7 + $0xe0] sm:$0xff]  ;;  %v3197_v10 = vld [vmem:[#allocation7 + $0x150] sm:$0xff]  ;;  %1097 = vmatpush.bf16.msrb.mxu3 %v3187_v12  ;;  %v3208_v3 = vld [vmem:[#allocation7 + $0x1a8] sm:$0xff] }
  0xe1   : > { %1079 = vmatpush.bf16.msra.mxu2 %v3183_v1  ;;  %v3216_v1 = vld [vmem:[#allocation7 + $0x1e8] sm:$0xff]  ;;  %1358 = vmatpush.bf16.msra.mxu1 %v3208_v3  ;;  %v3222_v12 = vld [vmem:[#allocation7 + $0x218] sm:$0xff]  ;;  %v3241_v3 = vld [vmem:[#allocation7 + $0x2b0] sm:$0xff] }
  0xe3   : > { %v533_v4 = vpop.f32.mrf.mxu2  ;;  %1108 = vmatpush.bf16.msrb.mxu0 %v3198_v6  ;;  %v3207_v6 = vld [vmem:[#allocation7 + $0x1a0] sm:$0xff] }
  0xe4   : > { %v547_v14 = vrot.slane %v533_v4, 1  ;;  %v3182_v4 = vld [vmem:[#allocation7 + $0xd8] sm:$0xff] }
  0xe5   : > { %1080 = vmatpush.bf16.msra.mxu2 %v3182_v4  ;;  %v3215_v4 = vld [vmem:[#allocation7 + $0x1e0] sm:$0xff]  ;;  %1359 = vmatpush.bf16.msra.mxu1 %v3207_v6  ;;  %v3240_v6 = vld [vmem:[#allocation7 + $0x2a8] sm:$0xff] }
  0xe7   : > { %1109 = vmatpush.bf16.msrb.mxu0 %v3197_v10  ;;  %v3206_v10 = vld [vmem:[#allocation7 + $0x198] sm:$0xff] }
  0xe9   : > { %1081 = vmatpush.bf16.msra.mxu2 %v3181_v8  ;;  %v3214_v8 = vld [vmem:[#allocation7 + $0x1d8] sm:$0xff]  ;;  %1360 = vmatpush.bf16.msra.mxu1 %v3206_v10  ;;  %v3239_v10 = vld [vmem:[#allocation7 + $0x2a0] sm:$0xff] }
  0xeb   : > { %v535_v13 = vpop.f32.mrf.mxu2 }
  0xec   : > { %v548_v16 = vrot.slane %v535_v13, 1  ;;  %v3196_v13 = vld [vmem:[#allocation7 + $0x148] sm:$0xff] }
  0xed   : > { %1082 = vmatpush.bf16.msra.mxu2 %v3180_v11  ;;  %1110 = vmatpush.bf16.msrb.mxu0 %v3196_v13  ;;  %v3213_v11 = vld [vmem:[#allocation7 + $0x1d0] sm:$0xff] }
  0xee   : > { %v550_v20 = vsel %vm549_vm3, %v547_v14, %v548_v16  ;;  %v551_v21 = vsel %vm549_vm3, %v548_v16, %v547_v14  ;;  %v3179_v14 = vld [vmem:[#allocation7 + $0xc0] sm:$0xff]  ;;  %v3205_v13 = vld [vmem:[#allocation7 + $0x190] sm:$0xff] }
  0xef   : > { %v553_v22 = vsel %vm3847_vm4, %v551_v21, 0.0  ;;  %v554_v23 = vadd.f32 %v550_v20, %v545_v17  ;;  %v3195_v16 = vld [vmem:[#allocation7 + $0x140] sm:$0xff]  ;;  %1361 = vmatpush.bf16.msra.mxu1 %v3205_v13  ;;  %v3238_v13 = vld [vmem:[#allocation7 + $0x298] sm:$0xff] }
  0xf0   : > { %v555_v24 = vadd.f32 %v553_v22, %v546_v19  ;;  %v3404_v17 = vld [vmem:[#allocation8] ss:$0 sm:$0xff] }
  0xf1   : > { %v560_v25 = vadd.f32 %v3403_v18, %v554_v23  ;;  %1083 = vmatpush.bf16.msra.mxu2 %v3179_v14  ;;  %1111 = vmatpush.bf16.msrb.mxu0 %v3195_v16  ;;  %v3212_v14 = vld [vmem:[#allocation7 + $0x1c8] sm:$0xff]  ;;  %v3221_v16 = vld [vmem:[#allocation7 + $0x210] sm:$0xff] }
  0xf2   : > { %v561_v26 = vadd.f32 %v3403_v18, %v555_v24 }
  0xf3   : > { %v3860_v27 = vmax.f32 %v560_v25, 0.0 }
  0xf4   : > { %v3862_v28 = vmax.f32 %v561_v26, 0.0 }
  0xf5   : > { %v572_v29 = vpack.c.bf16 %v3860_v27, %v3860_v27  ;;  %v564_v30 = vrot.slane %v3860_v27, 7  ;;  %v574_v31 = vrot.slane %v3860_v27, 1  ;;  %1370 = vmatpush.bf16.msrb.mxu2 %v3218_v59 }
  0xf6   : > { %v573_v32 = vpack.c.bf16 %v3862_v28, %v3862_v28  ;;  %v565_v33 = vrot.slane %v3862_v28, 7  ;;  %v575_v34 = vrot.slane %v3862_v28, 1 }
  0xf7   : > { %v590_v35 = vunpack.c.l.b16 %v572_v29 }
  0xf8   : > { %v591_v36 = vunpack.c.l.b16 %v573_v32  ;;  %v566_v37 = vsel %vm540_vm1, %v564_v30, %v565_v33  ;;  %v567_v38 = vsel %vm540_vm1, %v565_v33, %v564_v30  ;;  %v576_v39 = vsel %vm549_vm3, %v574_v31, %v575_v34 }
  0xf9   : > { %v568_v40 = vsel %vm3836_vm2, %v567_v38, 0.0  ;;  %v571_v41 = vpack.c.bf16 %v566_v37, %v566_v37  ;;  %v577_v42 = vsel %vm549_vm3, %v575_v34, %v574_v31  ;;  %v580_v43 = vpack.c.bf16 %v576_v39, %v576_v39  ;;  %1371 = vmatpush.bf16.msrb.mxu2 %v3217_v61 }
  0xfa   : > { %v592_v44 = vpack.c.b16 %v591_v36, %v590_v35  ;;  %v570_v45 = vpack.c.bf16 %v568_v40, %v568_v40  ;;  %v579_v46 = vsel %vm3847_vm4, %v577_v42, 0.0 }
  0xfb   : > { %v585_v47 = vunpack.c.l.b16 %v571_v41  ;;  %v581_v48 = vpack.c.bf16 %v579_v46, %v579_v46  ;;  %v596_v49 = vunpack.c.l.b16 %v580_v43 }
  0xfc   : > { %818 = vmatmul.bf16.vlgmr.msra.gmra.mxu0 %v592_v44  ;;  %v584_v50 = vunpack.c.l.b16 %v570_v45 }
  0xfd   : > { %v597_v51 = vunpack.c.l.b16 %v581_v48  ;;  %1372 = vmatpush.bf16.msrb.mxu2 %v3216_v1 }
  0xfe   : > { %v586_v52 = vpack.c.b16 %v585_v47, %v584_v50 }
  0xff   : > { %v598_v53 = vpack.c.b16 %v597_v51, %v596_v49 }
 0x100   : > { %804 = vmatmul.bf16.vlgmr.msra.gmra.mxu3 %v586_v52 }
 0x101   : > { %832 = vmatmul.bf16.vlgmr.msrb.gmra.mxu1 %v598_v53  ;;  %1384 = vmatpush.bf16.msra.mxu3 %v3226_v62 }
 0x102   : > { %1373 = vmatpush.bf16.msrb.mxu2 %v3215_v4  ;;  %v3250_v4 = vld [vmem:[#allocation7 + $0x2f8] sm:$0xff] }
 0x105   : > { %1385 = vmatpush.bf16.msra.mxu3 %v3225_v2  ;;  %v3234_v2 = vld [vmem:[#allocation7 + $0x278] sm:$0xff] }
 0x106   : > { %1374 = vmatpush.bf16.msrb.mxu2 %v3214_v8  ;;  %1636 = vmatpush.bf16.msra.mxu0 %v3234_v2  ;;  %v3249_v8 = vld [vmem:[#allocation7 + $0x2f0] sm:$0xff] }
 0x109   : > { %1386 = vmatpush.bf16.msra.mxu3 %v3224_v5  ;;  %v3233_v5 = vld [vmem:[#allocation7 + $0x270] sm:$0xff] }
 0x10a   : > { %1375 = vmatpush.bf16.msrb.mxu2 %v3213_v11  ;;  %1637 = vmatpush.bf16.msra.mxu0 %v3233_v5  ;;  %v3248_v11 = vld [vmem:[#allocation7 + $0x2e8] sm:$0xff] }
 0x10d   : > { %1387 = vmatpush.bf16.msra.mxu3 %v3223_v9  ;;  %v3232_v9 = vld [vmem:[#allocation7 + $0x268] sm:$0xff] }
 0x10e   : > { %1376 = vmatpush.bf16.msrb.mxu2 %v3212_v14  ;;  %1638 = vmatpush.bf16.msra.mxu0 %v3232_v9  ;;  %v3247_v14 = vld [vmem:[#allocation7 + $0x2e0] sm:$0xff]  ;;  %v3265_v9 = vld [vmem:[#allocation7 + $0x370] sm:$0xff] }
 0x111   : > { %1388 = vmatpush.bf16.msra.mxu3 %v3222_v12  ;;  %v3231_v12 = vld [vmem:[#allocation7 + $0x260] sm:$0xff] }
 0x112   : > { %1639 = vmatpush.bf16.msra.mxu0 %v3231_v12  ;;  %v3264_v12 = vld [vmem:[#allocation7 + $0x368] sm:$0xff] }
 0x115   : > { %1389 = vmatpush.bf16.msra.mxu3 %v3221_v16  ;;  %v3230_v16 = vld [vmem:[#allocation7 + $0x258] sm:$0xff] }
 0x116   : > { %1640 = vmatpush.bf16.msra.mxu0 %v3230_v16  ;;  %v3263_v16 = vld [vmem:[#allocation7 + $0x360] sm:$0xff] }
 0x179   : > { %v819_v18 = vpop.f32.mrf.mxu0 }
 0x17e   : > { %v833_v21 = vpop.f32.mrf.mxu1 }
 0x181   : > { %v821_v29 = vpop.f32.mrf.mxu0 }
 0x183   : > { %v805_v19 = vpop.f32.mrf.mxu3 }
 0x184   : > { %v806_v20 = vadd.f32 %v3404_v17, %v805_v19  ;;  %v3220_v19 = vld [vmem:[#allocation7 + $0x208] sm:$0xff] }
 0x185   : > { %1390 = vmatpush.bf16.msra.mxu3 %v3220_v19  ;;  %v3229_v19 = vld [vmem:[#allocation7 + $0x250] sm:$0xff] }
 0x186   : > { %v820_v22 = vadd.f32 %v819_v18, %v806_v20  ;;  %v835_v32 = vpop.f32.mrf.mxu1  ;;  %v3211_v18 = vld [vmem:[#allocation7 + $0x1c0] sm:$0xff]  ;;  %1641 = vmatpush.bf16.msra.mxu0 %v3229_v19  ;;  %v3262_v19 = vld [vmem:[#allocation7 + $0x358] sm:$0xff] }
 0x187   : > { %1377 = vmatpush.bf16.msrb.mxu2 %v3211_v18  ;;  %v3203_v20 = vld [vmem:[#allocation7 + $0x180] sm:$0xff]  ;;  %v3246_v18 = vld [vmem:[#allocation7 + $0x2d8] sm:$0xff] }
 0x188   : > { %v834_v23 = vadd.f32 %v833_v21, %v820_v22  ;;  %v3219_v21 = vld [vmem:[#allocation7 + $0x200] sm:$0xff] }
 0x189   : > { %1391 = vmatpush.bf16.msra.mxu3 %v3219_v21  ;;  %v3405_v22 = vld [vmem:[#allocation8 + $0x1] ss:$0 sm:$0xff]  ;;  %v3245_v21 = vld [vmem:[#allocation7 + $0x2d0] sm:$0xff] }
 0x18a   : > { %v838_v24 = vmax.f32 %v834_v23, 0.0  ;;  %v3242_v23 = vld [vmem:[#allocation7 + $0x2b8] sm:$0xff] }
 0x18b   : > { %v807_v25 = vpop.f32.mrf.mxu3 }
 0x18c   : > { %v808_v26 = vadd.f32 %v3404_v17, %v807_v25  ;;  %v3885_v31 = vadd.f32 %v838_v24, %v3860_v27  ;;  %v3204_v17 = vld [vmem:[#allocation7 + $0x188] sm:$0xff] }
 0x18d   : > { %1362 = vmatpush.bf16.msra.mxu1 %v3204_v17  ;;  %v3237_v17 = vld [vmem:[#allocation7 + $0x290] sm:$0xff] }
 0x18e   : > { %v822_v30 = vadd.f32 %v821_v29, %v808_v26  ;;  %v850_v35 = vpack.c.bf16 %v3885_v31, %v3885_v31  ;;  %v842_v37 = vrot.slane %v3885_v31, 7  ;;  %v852_v40 = vrot.slane %v3885_v31, 1 }
 0x190   : > { %v836_v33 = vadd.f32 %v835_v32, %v822_v30  ;;  %v868_v41 = vunpack.c.l.b16 %v850_v35 }
 0x191   : > { %1363 = vmatpush.bf16.msra.mxu1 %v3203_v20  ;;  %v3236_v20 = vld [vmem:[#allocation7 + $0x288] sm:$0xff] }
 0x192   : > { %v839_v34 = vmax.f32 %v836_v33, 0.0 }
 0x194   : > { %v3890_v36 = vadd.f32 %v839_v34, %v3862_v28 }
 0x195   : > { %1650 = vmatpush.bf16.msrb.mxu1 %v3242_v23  ;;  %v3235_v23 = vld [vmem:[#allocation7 + $0x280] sm:$0xff] }
 0x196   : > { %v851_v38 = vpack.c.bf16 %v3890_v36, %v3890_v36  ;;  %v843_v39 = vrot.slane %v3890_v36, 7  ;;  %v853_v27 = vrot.slane %v3890_v36, 1 }
 0x198   : > { %v869_v42 = vunpack.c.l.b16 %v851_v38  ;;  %v844_v43 = vsel %vm540_vm1, %v842_v37, %v843_v39  ;;  %v845_v28 = vsel %vm540_vm1, %v843_v39, %v842_v37  ;;  %v854_v44 = vsel %vm549_vm3, %v852_v40, %v853_v27 }
 0x199   : > { %v846_v45 = vsel %vm3836_vm2, %v845_v28, 0.0  ;;  %v849_v46 = vpack.c.bf16 %v844_v43, %v844_v43  ;;  %v855_v47 = vsel %vm549_vm3, %v853_v27, %v852_v40  ;;  %v858_v48 = vpack.c.bf16 %v854_v44, %v854_v44  ;;  %1651 = vmatpush.bf16.msrb.mxu1 %v3241_v3 }
 0x19a   : > { %v870_v49 = vpack.c.b16 %v869_v42, %v868_v41  ;;  %v848_v50 = vpack.c.bf16 %v846_v45, %v846_v45  ;;  %v857_v51 = vsel %vm3847_vm4, %v855_v47, 0.0 }
 0x19b   : > { %v863_v52 = vunpack.c.l.b16 %v849_v46  ;;  %v859_v53 = vpack.c.bf16 %v857_v51, %v857_v51  ;;  %v874_v54 = vunpack.c.l.b16 %v858_v48 }
 0x19c   : > { %1098 = vmatmul.bf16.vlgmr.msrb.gmra.mxu3 %v870_v49  ;;  %v862_v55 = vunpack.c.l.b16 %v848_v50 }
 0x19d   : > { %v875_v56 = vunpack.c.l.b16 %v859_v53  ;;  %1652 = vmatpush.bf16.msrb.mxu1 %v3240_v6  ;;  %v3266_v6 = vld [vmem:[#allocation7 + $0x378] sm:$0xff] }
 0x19e   : > { %v864_v57 = vpack.c.b16 %v863_v52, %v862_v55 }
 0x19f   : > { %v876_v58 = vpack.c.b16 %v875_v56, %v874_v54 }
 0x1a0   : > { %1084 = vmatmul.bf16.vlgmr.msra.gmra.mxu2 %v864_v57 }
 0x1a1   : > { %1112 = vmatmul.bf16.vlgmr.msrb.gmra.mxu0 %v876_v58  ;;  %1664 = vmatpush.bf16.msra.mxu2 %v3250_v4 }
 0x1a2   : > { %1653 = vmatpush.bf16.msrb.mxu1 %v3239_v10  ;;  %v3274_v10 = vld [vmem:[#allocation7 + $0x3b8] sm:$0xff] }
 0x1a5   : > { %1665 = vmatpush.bf16.msra.mxu2 %v3249_v8  ;;  %v3258_v8 = vld [vmem:[#allocation7 + $0x338] sm:$0xff] }
 0x1a6   : > { %1654 = vmatpush.bf16.msrb.mxu1 %v3238_v13  ;;  %1916 = vmatpush.bf16.msrb.mxu3 %v3258_v8  ;;  %v3273_v13 = vld [vmem:[#allocation7 + $0x3b0] sm:$0xff] }
 0x1a9   : > { %1666 = vmatpush.bf16.msra.mxu2 %v3248_v11  ;;  %v3257_v11 = vld [vmem:[#allocation7 + $0x330] sm:$0xff] }
 0x1aa   : > { %1655 = vmatpush.bf16.msrb.mxu1 %v3237_v17  ;;  %1917 = vmatpush.bf16.msrb.mxu3 %v3257_v11  ;;  %v3272_v17 = vld [vmem:[#allocation7 + $0x3a8] sm:$0xff] }
 0x1ad   : > { %1667 = vmatpush.bf16.msra.mxu2 %v3247_v14  ;;  %v3256_v14 = vld [vmem:[#allocation7 + $0x328] sm:$0xff] }
 0x1ae   : > { %1656 = vmatpush.bf16.msrb.mxu1 %v3236_v20  ;;  %1918 = vmatpush.bf16.msrb.mxu3 %v3256_v14  ;;  %v3271_v20 = vld [vmem:[#allocation7 + $0x3a0] sm:$0xff]  ;;  %v3289_v14 = vld [vmem:[#allocation7 + $0x430] sm:$0xff] }
 0x1b1   : > { %1668 = vmatpush.bf16.msra.mxu2 %v3246_v18  ;;  %v3255_v18 = vld [vmem:[#allocation7 + $0x320] sm:$0xff] }
 0x1b2   : > { %1657 = vmatpush.bf16.msrb.mxu1 %v3235_v23  ;;  %1919 = vmatpush.bf16.msrb.mxu3 %v3255_v18  ;;  %v3270_v23 = vld [vmem:[#allocation7 + $0x398] sm:$0xff]  ;;  %v3288_v18 = vld [vmem:[#allocation7 + $0x428] sm:$0xff] }
 0x1b5   : > { %1669 = vmatpush.bf16.msra.mxu2 %v3245_v21  ;;  %v3254_v21 = vld [vmem:[#allocation7 + $0x318] sm:$0xff] }
 0x1b6   : > { %1920 = vmatpush.bf16.msrb.mxu3 %v3254_v21  ;;  %v3287_v21 = vld [vmem:[#allocation7 + $0x420] sm:$0xff] }
 0x21e   : > { %v1113_v29 = vpop.f32.mrf.mxu0 }
 0x21f   : > { %v1099_v24 = vpop.f32.mrf.mxu3 }
 0x223   : > { %v1085_v25 = vpop.f32.mrf.mxu2 }
 0x224   : > { %v1086_v26 = vadd.f32 %v3405_v22, %v1085_v25  ;;  %v3227_v25 = vld [vmem:[#allocation7 + $0x240] sm:$0xff] }
 0x226   : > { %v1100_v30 = vadd.f32 %v1099_v24, %v1086_v26  ;;  %v1115_v40 = vpop.f32.mrf.mxu0  ;;  %v3244_v24 = vld [vmem:[#allocation7 + $0x2c8] sm:$0xff]  ;;  %v3243_v26 = vld [vmem:[#allocation7 + $0x2c0] sm:$0xff] }
 0x227   : > { %v1101_v37 = vpop.f32.mrf.mxu3  ;;  %1670 = vmatpush.bf16.msra.mxu2 %v3244_v24  ;;  %v3253_v24 = vld [vmem:[#allocation7 + $0x310] sm:$0xff] }
 0x228   : > { %v1114_v32 = vadd.f32 %v1113_v29, %v1100_v30  ;;  %v3406_v29 = vld [vmem:[#allocation8 + $0x2] ss:$0 sm:$0xff]  ;;  %1921 = vmatpush.bf16.msrb.mxu3 %v3253_v24  ;;  %v3286_v24 = vld [vmem:[#allocation7 + $0x418] sm:$0xff] }
 0x22a   : > { %v1118_v33 = vmax.f32 %v1114_v32, 0.0 }
 0x22b   : > { %v1087_v34 = vpop.f32.mrf.mxu2  ;;  %1671 = vmatpush.bf16.msra.mxu2 %v3243_v26  ;;  %v3269_v26 = vld [vmem:[#allocation7 + $0x390] sm:$0xff] }
 0x22c   : > { %v1088_v35 = vadd.f32 %v3405_v22, %v1087_v34  ;;  %v3911_v39 = vadd.f32 %v1118_v33, %v3885_v31  ;;  %v3228_v22 = vld [vmem:[#allocation7 + $0x248] sm:$0xff] }
 0x22d   : > { %1642 = vmatpush.bf16.msra.mxu0 %v3228_v22  ;;  %v3261_v22 = vld [vmem:[#allocation7 + $0x350] sm:$0xff] }
 0x22e   : > { %v1102_v38 = vadd.f32 %v1101_v37, %v1088_v35  ;;  %v1130_v42 = vpack.c.bf16 %v3911_v39, %v3911_v39  ;;  %v1122_v28 = vrot.slane %v3911_v39, 7  ;;  %v1132_v46 = vrot.slane %v3911_v39, 1 }
 0x230   : > { %v1116_v27 = vadd.f32 %v1115_v40, %v1102_v38  ;;  %v1148_v47 = vunpack.c.l.b16 %v1130_v42 }
 0x231   : > { %1643 = vmatpush.bf16.msra.mxu0 %v3227_v25  ;;  %v3260_v25 = vld [vmem:[#allocation7 + $0x348] sm:$0xff] }
 0x232   : > { %v1119_v41 = vmax.f32 %v1116_v27, 0.0 }
 0x234   : > { %v3916_v43 = vadd.f32 %v1119_v41, %v3890_v36 }
 0x235   : > { %1930 = vmatpush.bf16.msrb.mxu0 %v3266_v6 }
 0x236   : > { %v1131_v44 = vpack.c.bf16 %v3916_v43, %v3916_v43  ;;  %v1123_v45 = vrot.slane %v3916_v43, 7  ;;  %v1133_v31 = vrot.slane %v3916_v43, 1 }
 0x238   : > { %v1149_v48 = vunpack.c.l.b16 %v1131_v44  ;;  %v1124_v49 = vsel %vm540_vm1, %v1122_v28, %v1123_v45  ;;  %v1125_v36 = vsel %vm540_vm1, %v1123_v45, %v1122_v28  ;;  %v1134_v50 = vsel %vm549_vm3, %v1132_v46, %v1133_v31 }
 0x239   : > { %v1126_v51 = vsel %vm3836_vm2, %v1125_v36, 0.0  ;;  %v1129_v52 = vpack.c.bf16 %v1124_v49, %v1124_v49  ;;  %v1135_v53 = vsel %vm549_vm3, %v1133_v31, %v1132_v46  ;;  %v1138_v54 = vpack.c.bf16 %v1134_v50, %v1134_v50  ;;  %1931 = vmatpush.bf16.msrb.mxu0 %v3265_v9 }
 0x23a   : > { %v1150_v55 = vpack.c.b16 %v1149_v48, %v1148_v47  ;;  %v1128_v56 = vpack.c.bf16 %v1126_v51, %v1126_v51  ;;  %v1137_v57 = vsel %vm3847_vm4, %v1135_v53, 0.0 }
 0x23b   : > { %v1143_v58 = vunpack.c.l.b16 %v1129_v52  ;;  %v1139_v59 = vpack.c.bf16 %v1137_v57, %v1137_v57  ;;  %v1154_v60 = vunpack.c.l.b16 %v1138_v54 }
 0x23c   : > { %1378 = vmatmul.bf16.vlgmr.msrb.gmra.mxu2 %v1150_v55  ;;  %v1142_v61 = vunpack.c.l.b16 %v1128_v56 }
 0x23d   : > { %v1155_v62 = vunpack.c.l.b16 %v1139_v59  ;;  %1932 = vmatpush.bf16.msrb.mxu0 %v3264_v12  ;;  %v3290_v12 = vld [vmem:[#allocation7 + $0x438] sm:$0xff] }
 0x23e   : > { %v1144_v63 = vpack.c.b16 %v1143_v58, %v1142_v61 }
 0x23f   : > { %v1156_v1 = vpack.c.b16 %v1155_v62, %v1154_v60 }
 0x240   : > { %1364 = vmatmul.bf16.vlgmr.msra.gmra.mxu1 %v1144_v63 }
 0x241   : > { %1392 = vmatmul.bf16.vlgmr.msra.gmra.mxu3 %v1156_v1  ;;  %1944 = vmatpush.bf16.msra.mxu1 %v3274_v10 }
 0x242   : > { %1933 = vmatpush.bf16.msrb.mxu0 %v3263_v16  ;;  %v3298_v16 = vld [vmem:[#allocation7 + $0x478] sm:$0xff] }
 0x245   : > { %1945 = vmatpush.bf16.msra.mxu1 %v3273_v13  ;;  %v3282_v13 = vld [vmem:[#allocation7 + $0x3f8] sm:$0xff] }
 0x246   : > { %1934 = vmatpush.bf16.msrb.mxu0 %v3262_v19  ;;  %2196 = vmatpush.bf16.msrb.mxu2 %v3282_v13  ;;  %v3297_v19 = vld [vmem:[#allocation7 + $0x470] sm:$0xff] }
 0x249   : > { %1946 = vmatpush.bf16.msra.mxu1 %v3272_v17  ;;  %v3281_v17 = vld [vmem:[#allocation7 + $0x3f0] sm:$0xff] }
 0x24a   : > { %1935 = vmatpush.bf16.msrb.mxu0 %v3261_v22  ;;  %2197 = vmatpush.bf16.msrb.mxu2 %v3281_v17  ;;  %v3296_v22 = vld [vmem:[#allocation7 + $0x468] sm:$0xff] }
 0x24d   : > { %1947 = vmatpush.bf16.msra.mxu1 %v3271_v20  ;;  %v3280_v20 = vld [vmem:[#allocation7 + $0x3e8] sm:$0xff] }
 0x24e   : > { %1936 = vmatpush.bf16.msrb.mxu0 %v3260_v25  ;;  %2198 = vmatpush.bf16.msrb.mxu2 %v3280_v20  ;;  %v3295_v25 = vld [vmem:[#allocation7 + $0x460] sm:$0xff] }
 0x24f   : > { %v3302_v20 = vld [vmem:[#allocation10 + $0x18] sm:$0xff] }
 0x251   : > { %1948 = vmatpush.bf16.msra.mxu1 %v3270_v23  ;;  %v3279_v23 = vld [vmem:[#allocation7 + $0x3e0] sm:$0xff] }
 0x252   : > { %2199 = vmatpush.bf16.msrb.mxu2 %v3279_v23  ;;  %v3409_v23 = vld [vmem:[#allocation8 + $0x5] ss:$0 sm:$0xff] }
 0x255   : > { %1949 = vmatpush.bf16.msra.mxu1 %v3269_v26  ;;  %v3278_v26 = vld [vmem:[#allocation7 + $0x3d8] sm:$0xff] }
 0x256   : > { %2200 = vmatpush.bf16.msrb.mxu2 %v3278_v26 }
 0x2bd   : > { %v1365_v30 = vpop.f32.mrf.mxu1 }
 0x2be   : > { %v1366_v32 = vadd.f32 %v3406_v29, %v1365_v30  ;;  %v3259_v30 = vld [vmem:[#allocation7 + $0x340] sm:$0xff] }
 0x2bf   : > { %v1379_v33 = vpop.f32.mrf.mxu2  ;;  %1937 = vmatpush.bf16.msrb.mxu0 %v3259_v30  ;;  %v3294_v30 = vld [vmem:[#allocation7 + $0x458] sm:$0xff] }
 0x2c0   : > { %v1380_v34 = vadd.f32 %v1379_v33, %v1366_v32  ;;  %v3268_v32 = vld [vmem:[#allocation7 + $0x388] sm:$0xff]  ;;  %v3251_v33 = vld [vmem:[#allocation7 + $0x300] sm:$0xff] }
 0x2c1   : > { %1950 = vmatpush.bf16.msra.mxu1 %v3268_v32  ;;  %v3277_v32 = vld [vmem:[#allocation7 + $0x3d0] sm:$0xff] }
 0x2c2   : > { %2201 = vmatpush.bf16.msrb.mxu2 %v3277_v32 }
 0x2c4   : > { %v1393_v35 = vpop.f32.mrf.mxu3 }
 0x2c5   : > { %v1394_v37 = vadd.f32 %v1393_v35, %v1380_v34  ;;  %v1367_v38 = vpop.f32.mrf.mxu1  ;;  %v3267_v34 = vld [vmem:[#allocation7 + $0x380] sm:$0xff] }
 0x2c6   : > { %v1368_v40 = vadd.f32 %v3406_v29, %v1367_v38  ;;  %v3252_v29 = vld [vmem:[#allocation7 + $0x308] sm:$0xff]  ;;  %v3407_v35 = vld [vmem:[#allocation8 + $0x3] ss:$0 sm:$0xff]  ;;  %1951 = vmatpush.bf16.msra.mxu1 %v3267_v34  ;;  %v3293_v34 = vld [vmem:[#allocation7 + $0x450] sm:$0xff] }
 0x2c7   : > { %v1398_v27 = vmax.f32 %v1394_v37, 0.0  ;;  %v1381_v41 = vpop.f32.mrf.mxu2  ;;  %1922 = vmatpush.bf16.msrb.mxu3 %v3252_v29  ;;  %v3285_v29 = vld [vmem:[#allocation7 + $0x410] sm:$0xff] }
 0x2c8   : > { %v1382_v42 = vadd.f32 %v1381_v41, %v1368_v40 }
 0x2c9   : > { %v3937_v28 = vadd.f32 %v1398_v27, %v3911_v39 }
 0x2cb   : > { %v1410_v31 = vpack.c.bf16 %v3937_v28, %v3937_v28  ;;  %v1402_v48 = vrot.slane %v3937_v28, 7  ;;  %v1412_v49 = vrot.slane %v3937_v28, 1  ;;  %1923 = vmatpush.bf16.msrb.mxu3 %v3251_v33  ;;  %v3284_v33 = vld [vmem:[#allocation7 + $0x408] sm:$0xff] }
 0x2cc   : > { %v1395_v44 = vpop.f32.mrf.mxu3 }
 0x2cd   : > { %v1396_v45 = vadd.f32 %v1395_v44, %v1382_v42  ;;  %v1428_v51 = vunpack.c.l.b16 %v1410_v31 }
 0x2cf   : > { %v1399_v46 = vmax.f32 %v1396_v45, 0.0  ;;  %2210 = vmatpush.bf16.msra.mxu3 %v3290_v12 }
 0x2d1   : > { %v3942_v47 = vadd.f32 %v1399_v46, %v3916_v43 }
 0x2d3   : > { %v1403_v36 = vrot.slane %v3942_v47, 7  ;;  %v1413_v50 = vrot.slane %v3942_v47, 1  ;;  %v1411_v39 = vpack.c.bf16 %v3942_v47, %v3942_v47  ;;  %2211 = vmatpush.bf16.msra.mxu3 %v3289_v14 }
 0x2d5   : > { %v1429_v52 = vunpack.c.l.b16 %v1411_v39  ;;  %v1404_v53 = vsel %vm540_vm1, %v1402_v48, %v1403_v36  ;;  %v1405_v43 = vsel %vm540_vm1, %v1403_v36, %v1402_v48  ;;  %v1414_v54 = vsel %vm549_vm3, %v1412_v49, %v1413_v50 }
 0x2d6   : > { %v1406_v55 = vsel %vm3836_vm2, %v1405_v43, 0.0  ;;  %v1409_v56 = vpack.c.bf16 %v1404_v53, %v1404_v53  ;;  %v1415_v57 = vsel %vm549_vm3, %v1413_v50, %v1412_v49  ;;  %v1418_v58 = vpack.c.bf16 %v1414_v54, %v1414_v54 }
 0x2d7   : > { %v1430_v59 = vpack.c.b16 %v1429_v52, %v1428_v51  ;;  %v1408_v60 = vpack.c.bf16 %v1406_v55, %v1406_v55  ;;  %v1417_v61 = vsel %vm3847_vm4, %v1415_v57, 0.0  ;;  %2212 = vmatpush.bf16.msra.mxu3 %v3288_v18 }
 0x2d8   : > { %v1423_v62 = vunpack.c.l.b16 %v1409_v56  ;;  %v1419_v63 = vpack.c.bf16 %v1417_v61, %v1417_v61  ;;  %v1434_v1 = vunpack.c.l.b16 %v1418_v58 }
 0x2d9   : > { %1658 = vmatmul.bf16.vlgmr.msrb.gmra.mxu1 %v1430_v59  ;;  %v1422_v2 = vunpack.c.l.b16 %v1408_v60 }
 0x2da   : > { %v1435_v3 = vunpack.c.l.b16 %v1419_v63 }
 0x2db   : > { %v1424_v4 = vpack.c.b16 %v1423_v62, %v1422_v2  ;;  %2213 = vmatpush.bf16.msra.mxu3 %v3287_v21  ;;  %v3300_v21 = vld [vmem:[#allocation10 + $0x8] sm:$0xff] }
 0x2dc   : > { %v1436_v5 = vpack.c.b16 %v1435_v3, %v1434_v1 }
 0x2dd   : > { %1644 = vmatmul.bf16.vlgmr.msra.gmra.mxu0 %v1424_v4 }
 0x2de   : > { %1672 = vmatmul.bf16.vlgmr.msra.gmra.mxu2 %v1436_v5  ;;  %2224 = vmatpush.bf16.msra.mxu0 %v3298_v16 }
 0x2df   : > { %2214 = vmatpush.bf16.msra.mxu3 %v3286_v24 }
 0x2e2   : > { %2225 = vmatpush.bf16.msra.mxu0 %v3297_v19  ;;  %v3303_v19 = vld [vmem:[#allocation10 + $0x20] sm:$0xff] }
 0x2e3   : > { %2215 = vmatpush.bf16.msra.mxu3 %v3285_v29 }
 0x2e6   : > { %2226 = vmatpush.bf16.msra.mxu0 %v3296_v22  ;;  %v3299_v22 = vld [vmem:[#allocation10] sm:$0xff] }
 0x2e7   : > { %2216 = vmatpush.bf16.msra.mxu3 %v3284_v33 }
 0x2ea   : > { %2227 = vmatpush.bf16.msra.mxu0 %v3295_v25 }
 0x2ee   : > { %2228 = vmatpush.bf16.msra.mxu0 %v3294_v30 }
 0x2f2   : > { %2229 = vmatpush.bf16.msra.mxu0 %v3293_v34 }
 0x356   : > { %v1659_v40 = vpop.f32.mrf.mxu1 }
 0x35a   : > { %v1645_v37 = vpop.f32.mrf.mxu0 }
 0x35b   : > { %v1646_v38 = vadd.f32 %v3407_v35, %v1645_v37  ;;  %v3283_v37 = vld [vmem:[#allocation7 + $0x400] sm:$0xff] }
 0x35c   : > { %2217 = vmatpush.bf16.msra.mxu3 %v3283_v37 }
 0x35d   : > { %v1660_v27 = vadd.f32 %v1659_v40, %v1646_v38  ;;  %v3292_v38 = vld [vmem:[#allocation7 + $0x448] sm:$0xff]  ;;  %v3275_v40 = vld [vmem:[#allocation7 + $0x3c0] sm:$0xff] }
 0x35e   : > { %v1661_v31 = vpop.f32.mrf.mxu1  ;;  %2230 = vmatpush.bf16.msra.mxu0 %v3292_v38 }
 0x361   : > { %v1673_v41 = vpop.f32.mrf.mxu2 }
 0x362   : > { %v1674_v42 = vadd.f32 %v1673_v41, %v1660_v27  ;;  %v1647_v44 = vpop.f32.mrf.mxu0  ;;  %v3291_v27 = vld [vmem:[#allocation7 + $0x440] sm:$0xff] }
 0x363   : > { %v1648_v45 = vadd.f32 %v3407_v35, %v1647_v44  ;;  %v3276_v35 = vld [vmem:[#allocation7 + $0x3c8] sm:$0xff]  ;;  %2231 = vmatpush.bf16.msra.mxu0 %v3291_v27  ;;  %v3408_v41 = vld [vmem:[#allocation8 + $0x4] ss:$0 sm:$0xff] }
 0x364   : > { %v1678_v46 = vmax.f32 %v1674_v42, 0.0  ;;  %2202 = vmatpush.bf16.msrb.mxu2 %v3276_v35  ;;  %v3306_v42 = vld [vmem:[#allocation10 + $0x38] sm:$0xff] }
 0x365   : > { %v1662_v48 = vadd.f32 %v1661_v31, %v1648_v45  ;;  %2311 = vmatpush.bf16.msrb.mxu1 %v3306_v42 }
 0x366   : > { %v3963_v49 = vadd.f32 %v1678_v46, %v3937_v28 }
 0x368   : > { %v1690_v51 = vpack.c.bf16 %v3963_v49, %v3963_v49  ;;  %v1682_v53 = vrot.slane %v3963_v49, 7  ;;  %v1692_v43 = vrot.slane %v3963_v49, 1  ;;  %2203 = vmatpush.bf16.msrb.mxu2 %v3275_v40 }
 0x369   : > { %v1675_v36 = vpop.f32.mrf.mxu2  ;;  %2312 = vmatpush.bf16.msrb.mxu1 %v3305_v7 }
 0x36a   : > { %v1676_v50 = vadd.f32 %v1675_v36, %v1662_v48  ;;  %v1708_v56 = vunpack.c.l.b16 %v1690_v51 }
 0x36c   : > { %v1679_v39 = vmax.f32 %v1676_v50, 0.0 }
 0x36d   : > { %2313 = vmatpush.bf16.msrb.mxu1 %v3304_v0 }
 0x36e   : > { %v3968_v52 = vadd.f32 %v1679_v39, %v3942_v47 }
 0x370   : > { %v1683_v54 = vrot.slane %v3968_v52, 7  ;;  %v1693_v55 = vrot.slane %v3968_v52, 1  ;;  %v1691_v28 = vpack.c.bf16 %v3968_v52, %v3968_v52 }
 0x371   : > { %2314 = vmatpush.bf16.msrb.mxu1 %v3303_v19 }
 0x372   : > { %v1709_v57 = vunpack.c.l.b16 %v1691_v28  ;;  %v1684_v58 = vsel %vm540_vm1, %v1682_v53, %v1683_v54  ;;  %v1685_v47 = vsel %vm540_vm1, %v1683_v54, %v1682_v53  ;;  %v1694_v59 = vsel %vm549_vm3, %v1692_v43, %v1693_v55 }
 0x373   : > { %v1686_v60 = vsel %vm3836_vm2, %v1685_v47, 0.0  ;;  %v1689_v61 = vpack.c.bf16 %v1684_v58, %v1684_v58  ;;  %v1695_v62 = vsel %vm549_vm3, %v1693_v55, %v1692_v43  ;;  %v1698_v63 = vpack.c.bf16 %v1694_v59, %v1694_v59 }
 0x374   : > { %v1710_v1 = vpack.c.b16 %v1709_v57, %v1708_v56  ;;  %v1688_v2 = vpack.c.bf16 %v1686_v60, %v1686_v60  ;;  %v1697_v3 = vsel %vm3847_vm4, %v1695_v62, 0.0 }
 0x375   : > { %v1703_v4 = vunpack.c.l.b16 %v1689_v61  ;;  %v1699_v5 = vpack.c.bf16 %v1697_v3, %v1697_v3  ;;  %v1714_v6 = vunpack.c.l.b16 %v1698_v63  ;;  %2315 = vmatpush.bf16.msrb.mxu1 %v3302_v20 }
 0x376   : > { %1938 = vmatmul.bf16.vlgmr.msrb.gmra.mxu0 %v1710_v1  ;;  %v1702_v8 = vunpack.c.l.b16 %v1688_v2 }
 0x377   : > { %v1715_v9 = vunpack.c.l.b16 %v1699_v5 }
 0x378   : > { %v1704_v10 = vpack.c.b16 %v1703_v4, %v1702_v8 }
 0x379   : > { %v1716_v11 = vpack.c.b16 %v1715_v9, %v1714_v6  ;;  %2316 = vmatpush.bf16.msrb.mxu1 %v3301_v15 }
 0x37a   : > { %1924 = vmatmul.bf16.vlgmr.msrb.gmra.mxu3 %v1704_v10 }
 0x37b   : > { %1952 = vmatmul.bf16.vlgmr.msra.gmra.mxu1 %v1716_v11 }
 0x37d   : > { %2317 = vmatpush.bf16.msrb.mxu1 %v3300_v21 }
 0x381   : > { %2318 = vmatpush.bf16.msrb.mxu1 %v3299_v22 }
 0x3f3   : > { %v1939_v44 = vpop.f32.mrf.mxu0 }
 0x3f8   : > { %v1953_v31 = vpop.f32.mrf.mxu1 }
 0x3fb   : > { %v1941_v53 = vpop.f32.mrf.mxu0 }
 0x3fd   : > { %v1925_v45 = vpop.f32.mrf.mxu3 }
 0x3fe   : > { %v1926_v46 = vadd.f32 %v3408_v41, %v1925_v45 }
 0x400   : > { %v1940_v48 = vadd.f32 %v1939_v44, %v1926_v46  ;;  %v1955_v55 = vpop.f32.mrf.mxu1  ;;  %v3410_v46 = vld [vmem:[%s4045_s6] ss:$0 sm:$0xff] }
 0x402   : > { %v1954_v36 = vadd.f32 %v1953_v31, %v1940_v48 }
 0x404   : > { %v1958_v50 = vmax.f32 %v1954_v36, 0.0 }
 0x405   : > { %v1927_v39 = vpop.f32.mrf.mxu3 }
 0x406   : > { %v1928_v51 = vadd.f32 %v3408_v41, %v1927_v39  ;;  %v1960_v54 = vadd.f32 %v1958_v50, %v3963_v49 }
 0x408   : > { %v1942_v43 = vadd.f32 %v1941_v53, %v1928_v51  ;;  %v1970_v57 = vpack.c.bf16 %v1960_v54, %v1960_v54  ;;  %v1962_v47 = vrot.slane %v1960_v54, 7  ;;  %v1972_v61 = vrot.slane %v1960_v54, 1 }
 0x40a   : > { %v1956_v28 = vadd.f32 %v1955_v55, %v1942_v43  ;;  %v1988_v63 = vunpack.c.l.b16 %v1970_v57 }
 0x40c   : > { %v1959_v56 = vmax.f32 %v1956_v28, 0.0 }
 0x40e   : > { %v1961_v58 = vadd.f32 %v1959_v56, %v3968_v52 }
 0x410   : > { %v1971_v59 = vpack.c.bf16 %v1961_v58, %v1961_v58  ;;  %v1963_v60 = vrot.slane %v1961_v58, 7  ;;  %v1973_v62 = vrot.slane %v1961_v58, 1 }
 0x412   : > { %v1989_v1 = vunpack.c.l.b16 %v1971_v59  ;;  %v1964_v2 = vsel %vm540_vm1, %v1962_v47, %v1963_v60  ;;  %v1965_v3 = vsel %vm540_vm1, %v1963_v60, %v1962_v47  ;;  %v1974_v49 = vsel %vm549_vm3, %v1972_v61, %v1973_v62 }
 0x413   : > { %v1966_v4 = vsel %vm3836_vm2, %v1965_v3, 0.0  ;;  %v1969_v52 = vpack.c.bf16 %v1964_v2, %v1964_v2  ;;  %v1975_v5 = vsel %vm549_vm3, %v1973_v62, %v1972_v61  ;;  %v1978_v6 = vpack.c.bf16 %v1974_v49, %v1974_v49 }
 0x414   : > { %v1990_v8 = vpack.c.b16 %v1989_v1, %v1988_v63  ;;  %v1968_v9 = vpack.c.bf16 %v1966_v4, %v1966_v4  ;;  %v1977_v10 = vsel %vm3847_vm4, %v1975_v5, 0.0 }
 0x415   : > { %v1983_v11 = vunpack.c.l.b16 %v1969_v52  ;;  %v1979_v12 = vpack.c.bf16 %v1977_v10, %v1977_v10  ;;  %v1994_v13 = vunpack.c.l.b16 %v1978_v6 }
 0x416   : > { %2218 = vmatmul.bf16.vlgmr.msra.gmra.mxu3 %v1990_v8  ;;  %v1982_v14 = vunpack.c.l.b16 %v1968_v9 }
 0x417   : > { %v1995_v16 = vunpack.c.l.b16 %v1979_v12 }
 0x418   : > { %v1984_v17 = vpack.c.b16 %v1983_v11, %v1982_v14 }
 0x419   : > { %v1996_v18 = vpack.c.b16 %v1995_v16, %v1994_v13 }
 0x41a   : > { %2204 = vmatmul.bf16.vlgmr.msrb.gmra.mxu2 %v1984_v17 }
 0x41b   : > { %2232 = vmatmul.bf16.vlgmr.msra.gmra.mxu0 %v1996_v18 }
 0x498   : > { %v2233_v29 = vpop.f32.mrf.mxu0 }
 0x499   : > { %v2219_v24 = vpop.f32.mrf.mxu3 }
 0x49d   : > { %v2205_v25 = vpop.f32.mrf.mxu2 }
 0x49e   : > { %v2206_v26 = vadd.f32 %v3409_v23, %v2205_v25 }
 0x4a0   : > { %v2220_v30 = vadd.f32 %v2219_v24, %v2206_v26  ;;  %v2235_v38 = vpop.f32.mrf.mxu0 }
 0x4a1   : > { %v2221_v35 = vpop.f32.mrf.mxu3 }
 0x4a2   : > { %v2234_v33 = vadd.f32 %v2233_v29, %v2220_v30 }
 0x4a4   : > { %v2238_v40 = vmax.f32 %v2234_v33, 0.0 }
 0x4a5   : > { %v2207_v32 = vpop.f32.mrf.mxu2 }
 0x4a6   : > { %v2208_v34 = vadd.f32 %v3409_v23, %v2207_v32  ;;  %v2240_v42 = vadd.f32 %v2238_v40, %v1960_v54 }
 0x4a8   : > { %v2222_v37 = vadd.f32 %v2221_v35, %v2208_v34 }
 0x4aa   : > { %v2236_v27 = vadd.f32 %v2235_v38, %v2222_v37 }
 0x4ac   : > { %v2239_v41 = vmax.f32 %v2236_v27, 0.0 }
 0x4ae   : > { %v2241_v44 = vadd.f32 %v2239_v41, %v1961_v58 }
 0x4b0   : > { %v2242_v45 = vpack.c.bf16 %v2241_v44, %v2240_v42 }
 0x4b2   : > { %2319 = vmatmul.bf16.vlgmr.msrb.gmra.mxu1 %v2242_v45 }
 0x52f   : > { %v2320_v31 = vpop.f32.mrf.mxu1 }
 0x530   : > { %v2321_v48 = vadd.f32 %v3410_v46, %v2320_v31 }
 0x532   : > { %v2325_v36 = vmax.f32 %v2321_v48, 0.0 }
 0x534   : > { %2327 = vst [vmem:[%s364_s15] sm:$0xff] %v2325_v36 }
 0x537   : > { %v2322_v50 = vpop.f32.mrf.mxu1 }
 0x538   : > { %v2323_v39 = vadd.f32 %v3410_v46, %v2322_v50 }
 0x53a   : > { %v2326_v51 = vmax.f32 %v2323_v39, 0.0 }
 0x53c   : > { %2328 = vst [vmem:[%s364_s15 + $0x8] sm:$0xff] %v2326_v51 }
 0x53d   : > { %3588 = shalt.err (!%p3585_p10)
}
 0x53e   : > { %s3647_s11 = smov 128   ;;  %s3648_s29 = smov 8  }
 0x53f   : > { %3326 = dma.vmem_to_hbm [thread:$0]  (%p3779_p3), %s2343_s21, 256, %s2345_s20, %s2330_s1, %s3647_s11, %s3647_s11, %s3648_s29  }
 0x540 PF: > { %s2359_s14 = sand.u32 1, %s3623_s24   ;;  %p4063_p12 = scmp.ge.s32.totalorder %s3635_s27, 2 }
 0x541   : > { %s2360_s17 = scalar_lea.sflag [#allocation4], %s2359_s14 }
 0x542   : > { %p3346_p13 = pnand %p4063_p12, %p3724_p6 }
 0x544   : > { %p3347_p0 = pneg %p3346_p13 }
 0x546   : > { %3618 = dma.done.wait (%p3347_p0), %s2360_s17, 256  }
 0x547   : > { %3620 = vsyncadd (%p3347_p0), %s2360_s17, 4294967040  ;;  %p22_p5 = scmp.ge.s32.totalorder %s3769_s23, 4   ;;  %s4064_s24 = smov %s3627_s25 }
 0x548   : > { %s4065_s25 = smov %s3631_s26  ;;  %s4066_s26 = smov %s3785_s13 }
 0x549   : > { %s4067_s27 = smov %s3769_s23  ;;  %24 = sbr.rel (!%p22_p5) target bundleno = 9 (0x9), region = 119 }
 0x54e   :  { %2366 = vsyncpa [#allocation3], 1 }
 0x54f   :  { %2368 = vsyncpa [#allocation3 + $0x1], 1 }
 0x550   :  { %2369 = vsyncpa [#allocation6], 1 }
 0x551   :  { %2370 = vsyncpa [#allocation9], 1 }
 0x552   :  { %2371 = vsyncpa [#allocation4], 1 }
 0x553   :  { %2373 = vsyncpa [#allocation4 + $0x1], 1 }

</bundles_post_ra>
